<compile_context>
chip_gen: v7x
topology: tpu7x:2x2x1
jax: 0.10.0
libtpu: 0.0.40
codegen_flags: <defaults>
</compile_context>

<pallas_src>
import functools

import jax
import jax.numpy as jnp
from jax import lax
from jax.experimental import pallas as pl
from jax.experimental.pallas import tpu as pltpu


def _encoder_lstm_kernel(emb_ref, wih0_ref, wih_rest_ref, whh_ref, b_ref,
                         h_out_ref, c_out_ref, gx_ref, *,
                         hidden_size, num_layers):
    """Fused multi-layer LSTM over the whole (VMEM-resident) sequence.

    emb_ref:      (T, Bp, E)            padded embeddings (dropout = identity)
    wih0_ref:     (E, 4H)               layer-0 input->gates weights (transposed)
    wih_rest_ref: (max(L-1,1), H, 4H)   layers 1..L-1 input->gates weights (transposed)
    whh_ref:      (L, H, 4H)            hidden->gates weights (transposed)
    b_ref:        (L, 1, 4H)            bias_ih + bias_hh per layer
    h_out_ref, c_out_ref: (L, Bp, H)    final hidden / cell state per layer
    gx_ref:       (T, Bp, 4H) f32 VMEM scratch with the hoisted input projection
                  (+ bias) of the layer being processed; overwritten in place with
                  the NEXT layer's projection as each h_t is produced.
    """
    H = hidden_size
    L = num_layers
    T, Bp, E = emb_ref.shape
    G = 4 * H

    # Lane masks for the full-vreg gate nonlinearity. Gate layout along the 4H lanes
    # is PyTorch's [i | f | g | o]; i/f/o use sigmoid(x) = 0.5*tanh(x/2) + 0.5,
    # g uses tanh(x). One EUP tanh per step on the whole (Bp, 4H) tile.
    lane = lax.broadcasted_iota(jnp.int32, (Bp, G), 1)
    is_g = (lane >= 2 * H) & (lane < 3 * H)
    pre = jnp.where(is_g, 1.0, 0.5).astype(jnp.float32)   # pre- and post-scale
    off = jnp.where(is_g, 0.0, 0.5).astype(jnp.float32)   # post-offset

    # Hoisted layer-0 input projection: one big matmul over all T*Bp rows, bias folded.
    emb_flat = emb_ref[...].reshape(T * Bp, E)
    gx0 = jnp.dot(emb_flat, wih0_ref[...], preferred_element_type=jnp.float32)
    gx_ref[...] = (gx0 + b_ref[0]).reshape(T, Bp, G)

    for l in range(L):
        whh = whh_ref[l]                       # (H, 4H), hoisted out of the time loop
        if l + 1 < L:
            wih_next = wih_rest_ref[l]         # (H, 4H)
            b_next = b_ref[l + 1]              # (1, 4H)
        else:
            wih_next = None
            b_next = None

        def step(t, carry, whh=whh, wih_next=wih_next, b_next=b_next,
                 last=(l + 1 == L)):
            h, c = carry
            # Single in-chain matmul per step; x-projection + bias precomputed in gx.
            gates = gx_ref[t] + jnp.dot(h, whh, preferred_element_type=jnp.float32)
            act = jnp.tanh(gates * pre) * pre + off        # [sig(i)|sig(f)|tanh(g)|sig(o)]
            i = act[:, 0 * H:1 * H]
            f = act[:, 1 * H:2 * H]
            g = act[:, 2 * H:3 * H]
            o = act[:, 3 * H:4 * H]
            c = f * c + i * g
            h = o * jnp.tanh(c)
            if not last:
                # Hoist the NEXT layer's input projection: result is only needed in
                # the next layer pass (off this step's dependency chain), and the
                # store is lane-dense (Bp, 4H = 128 lanes).
                gx_ref[t] = (jnp.dot(h, wih_next, preferred_element_type=jnp.float32)
                             + b_next)
            return (h, c)

        h0 = jnp.zeros((Bp, H), jnp.float32)
        c0 = jnp.zeros((Bp, H), jnp.float32)
        h_fin, c_fin = lax.fori_loop(0, T, step, (h0, c0), unroll=True)
        h_out_ref[l] = h_fin
        c_out_ref[l] = c_fin


def encoder_lstm(emb_p, w_ih0_t, w_ih_rest_t, w_hh_t, bias, hidden_size, num_layers):
    """Run the fused multi-layer LSTM Pallas kernel. emb_p: (T, Bp, E) f32."""
    T, Bp, _ = emb_p.shape
    H = hidden_size
    L = num_layers
    kernel = functools.partial(_encoder_lstm_kernel,
                               hidden_size=H, num_layers=L)
    vmem = pl.BlockSpec(memory_space=pltpu.MemorySpace.VMEM)
    h_out, c_out = pl.pallas_call(
        kernel,
        out_shape=(
            jax.ShapeDtypeStruct((L, Bp, H), jnp.float32),
            jax.ShapeDtypeStruct((L, Bp, H), jnp.float32),
        ),
        in_specs=[vmem, vmem, vmem, vmem, vmem],
        out_specs=(vmem, vmem),
        scratch_shapes=[pltpu.VMEM((T, Bp, 4 * H), jnp.float32)],
        compiler_params=pltpu.CompilerParams(vmem_limit_bytes=32 * 1024 * 1024),
    )(emb_p, w_ih0_t, w_ih_rest_t, w_hh_t, bias)
    return h_out, c_out


def init_encoder_params(key, vocab_size, embedding_size, hidden_size, num_layers):
    """Deterministic synthetic parameters (same shapes as the PyTorch module)."""
    keys = jax.random.split(key, 1 + 4 * num_layers)
    params = {}
    # Embedding table (stands in for german_field.vocab.vectors).
    params["embedding"] = jax.random.normal(
        keys[0], (vocab_size, embedding_size), jnp.float32) * 0.1
    k_scale = 1.0 / jnp.sqrt(hidden_size)
    layers = []
    for l in range(num_layers):
        d_in = embedding_size if l == 0 else hidden_size
        k_wih, k_whh, k_bih, k_bhh = keys[1 + 4 * l: 1 + 4 * (l + 1)]
        w_ih = jax.random.uniform(k_wih, (4 * hidden_size, d_in),
                                  jnp.float32, -k_scale, k_scale)
        w_hh = jax.random.uniform(k_whh, (4 * hidden_size, hidden_size),
                                  jnp.float32, -k_scale, k_scale)
        b_ih = jax.random.uniform(k_bih, (4 * hidden_size,),
                                  jnp.float32, -k_scale, k_scale)
        b_hh = jax.random.uniform(k_bhh, (4 * hidden_size,),
                                  jnp.float32, -k_scale, k_scale)
        layers.append(dict(w_ih=w_ih, w_hh=w_hh, b_ih=b_ih, b_hh=b_hh))
    params["layers"] = layers
    return params


def encoder_forward(params, x_tokens, hidden_size, num_layers):
    """Encoder.forward: returns (hidden, cell), each (num_layers, B, H)."""
    H = hidden_size
    L = num_layers
    # Embedding lookup (gather) kept in plain JAX glue; dropout is identity (eval mode).
    # TODO(synk): training-mode dropout (and LSTM inter-layer dropout) not implemented.
    emb = jnp.take(params["embedding"], x_tokens, axis=0)        # (T, B, E)
    T, B, E = emb.shape
    # Pad batch to a multiple of 8 sublanes; padded rows are independent and discarded.
    Bp = ((B + 7) // 8) * 8
    emb_p = jnp.pad(emb, ((0, 0), (0, Bp - B), (0, 0)))

    layers = params["layers"]
    w_ih0_t = jnp.transpose(layers[0]["w_ih"])                   # (E, 4H)
    if L > 1:
        w_ih_rest_t = jnp.stack(
            [jnp.transpose(layers[l]["w_ih"]) for l in range(1, L)])  # (L-1, H, 4H)
    else:
        w_ih_rest_t = jnp.zeros((1, H, 4 * H), jnp.float32)      # unused dummy
    w_hh_t = jnp.stack([jnp.transpose(layers[l]["w_hh"]) for l in range(L)])  # (L, H, 4H)
    bias = jnp.stack([(layers[l]["b_ih"] + layers[l]["b_hh"]).reshape(1, 4 * H)
                      for l in range(L)])                        # (L, 1, 4H)

    h_out, c_out = encoder_lstm(emb_p, w_ih0_t, w_ih_rest_t, w_hh_t, bias, H, L)
    return h_out[:, :B, :], c_out[:, :B, :]


def _reference_forward(params, x_tokens, hidden_size, num_layers):
    """Pure-JAX reference (lax.scan) for correctness checking."""
    emb = jnp.take(params["embedding"], x_tokens, axis=0)
    layer_in = emb
    hs, cs = [], []
    H = hidden_size
    for l in range(num_layers):
        p = params["layers"][l]
        w_ih_t = jnp.transpose(p["w_ih"])
        w_hh_t = jnp.transpose(p["w_hh"])
        b = p["b_ih"] + p["b_hh"]
        B = layer_in.shape[1]

        def step(carry, x_t):
            h, c = carry
            gates = x_t @ w_ih_t + h @ w_hh_t + b
            i = jax.nn.sigmoid(gates[:, 0 * H:1 * H])
            f = jax.nn.sigmoid(gates[:, 1 * H:2 * H])
            g = jnp.tanh(gates[:, 2 * H:3 * H])
            o = jax.nn.sigmoid(gates[:, 3 * H:4 * H])
            c_new = f * c + i * g
            h_new = o * jnp.tanh(c_new)
            return (h_new, c_new), h_new

        init = (jnp.zeros((B, H), jnp.float32), jnp.zeros((B, H), jnp.float32))
        (h_n, c_n), ys = lax.scan(step, init, layer_in)
        hs.append(h_n)
        cs.append(c_n)
        layer_in = ys
    return jnp.stack(hs, 0), jnp.stack(cs, 0)


if __name__ == "__main__":
    # Small, forward-implied shapes.
    VOCAB = 50          # len(german.vocab)
    EMBED = 32          # PRM.DIM_VEC
    HIDDEN = 32         # PRM.HIDDEN_SIZE
    NUM_LAYERS = 2      # PRM.NUM_LAYERS
    SEQ = 8
    BATCH = 2

    key = jax.random.PRNGKey(0)
    k_param, k_tok = jax.random.split(key)
    params = init_encoder_params(k_param, VOCAB, EMBED, HIDDEN, NUM_LAYERS)
    x = jax.random.randint(k_tok, (SEQ, BATCH), 0, VOCAB, dtype=jnp.int32)

    fwd = jax.jit(functools.partial(encoder_forward,
                                    hidden_size=HIDDEN, num_layers=NUM_LAYERS))
    hidden, cell = fwd(params, x)
    hidden, cell = jax.block_until_ready((hidden, cell))

    ref_h, ref_c = _reference_forward(params, x, HIDDEN, NUM_LAYERS)
    assert hidden.shape == (NUM_LAYERS, BATCH, HIDDEN)
    assert cell.shape == (NUM_LAYERS, BATCH, HIDDEN)
    # sigmoid is computed as 0.5*tanh(x/2)+0.5 in-kernel; differences stay well below atol.
    assert jnp.allclose(hidden, ref_h, atol=1e-5, rtol=1e-5)
    assert jnp.allclose(cell, ref_c, atol=1e-5, rtol=1e-5)

    print("KERNEL_OK")
</pallas_src>

<mosaic_0001>
module attributes {stable_mosaic.version = 11 : i64} {
  func.func @_encoder_lstm_kernel(%arg0: memref<8x8x32xf32, #tpu.memory_space<vmem>>, %arg1: memref<32x128xf32, #tpu.memory_space<vmem>>, %arg2: memref<1x32x128xf32, #tpu.memory_space<vmem>>, %arg3: memref<2x32x128xf32, #tpu.memory_space<vmem>>, %arg4: memref<2x1x128xf32, #tpu.memory_space<vmem>>, %arg5: memref<2x8x32xf32, #tpu.memory_space<vmem>>, %arg6: memref<2x8x32xf32, #tpu.memory_space<vmem>>, %arg7: memref<8x8x128xf32, #tpu.memory_space<vmem>>) attributes {dimension_semantics = [], scalar_prefetch = 0 : i64, scratch_operands = 1 : i64, tpu.core_type = #tpu.core_type<tc>} {
    %0 = tpu.iota {dimensions = array<i32: 1>} : vector<8x128xi32>
    %c64_i32 = arith.constant 64 : i32
    %1 = vector.broadcast %c64_i32 : i32 to vector<8x128xi32>
    %2 = arith.cmpi sge, %0, %1 : vector<8x128xi32>
    %c96_i32 = arith.constant 96 : i32
    %3 = vector.broadcast %c96_i32 : i32 to vector<8x128xi32>
    %4 = arith.cmpi slt, %0, %3 : vector<8x128xi32>
    %5 = arith.andi %2, %4 : vector<8x128xi1>
    %cst = arith.constant 1.000000e+00 : f32
    %cst_0 = arith.constant 5.000000e-01 : f32
    %6 = vector.broadcast %cst : f32 to vector<8x128xf32>
    %7 = vector.broadcast %cst_0 : f32 to vector<8x128xf32>
    %8 = arith.select %5, %6, %7 : vector<8x128xi1>, vector<8x128xf32>
    %cst_1 = arith.constant 0.000000e+00 : f32
    %cst_2 = arith.constant 5.000000e-01 : f32
    %9 = vector.broadcast %cst_1 : f32 to vector<8x128xf32>
    %10 = vector.broadcast %cst_2 : f32 to vector<8x128xf32>
    %11 = arith.select %5, %9, %10 : vector<8x128xi1>, vector<8x128xf32>
    %c0 = arith.constant 0 : index
    %c0_3 = arith.constant 0 : index
    %c0_4 = arith.constant 0 : index
    %12 = vector.load %arg0[%c0, %c0_3, %c0_4] : memref<8x8x32xf32, #tpu.memory_space<vmem>>, vector<8x8x32xf32>
    %13 = vector.shape_cast %12 : vector<8x8x32xf32> to vector<64x32xf32>
    %c0_5 = arith.constant 0 : index
    %c0_6 = arith.constant 0 : index
    %14 = vector.load %arg1[%c0_5, %c0_6] : memref<32x128xf32, #tpu.memory_space<vmem>>, vector<32x128xf32>
    %cst_7 = arith.constant dense<0.000000e+00> : vector<64x128xf32>
    %15 = tpu.matmul %13, %14, %cst_7 {dimension_numbers = #tpu.dot_dimension_numbers<[1], [0], [0], [1], [0, 0, 1, 1], [], []>} : vector<64x32xf32>, vector<32x128xf32>, vector<64x128xf32> -> vector<64x128xf32>
    %c0_8 = arith.constant 0 : index
    %c0_9 = arith.constant 0 : index
    %c0_10 = arith.constant 0 : index
    %16 = vector.load %arg4[%c0_8, %c0_9, %c0_10] : memref<2x1x128xf32, #tpu.memory_space<vmem>>, vector<1x1x128xf32>
    %17 = vector.shape_cast %16 : vector<1x1x128xf32> to vector<1x128xf32>
    %18 = vector.broadcast %17 : vector<1x128xf32> to vector<64x128xf32>
    %19 = arith.addf %15, %18 : vector<64x128xf32>
    %20 = vector.shape_cast %19 : vector<64x128xf32> to vector<8x8x128xf32>
    %c0_11 = arith.constant 0 : index
    %c0_12 = arith.constant 0 : index
    %c0_13 = arith.constant 0 : index
    %21 = vector.load %arg7[%c0_11, %c0_12, %c0_13] : memref<8x8x128xf32, #tpu.memory_space<vmem>>, vector<8x8x128xf32>
    tpu.vector_store %arg7[%c0_11, %c0_12, %c0_13], %20 {strides = array<i32>} : memref<8x8x128xf32, #tpu.memory_space<vmem>>, vector<8x8x128xf32>,
    %c0_14 = arith.constant 0 : index
    %c0_15 = arith.constant 0 : index
    %c0_16 = arith.constant 0 : index
    %22 = vector.load %arg3[%c0_14, %c0_15, %c0_16] : memref<2x32x128xf32, #tpu.memory_space<vmem>>, vector<1x32x128xf32>
    %23 = vector.shape_cast %22 : vector<1x32x128xf32> to vector<32x128xf32>
    %c0_17 = arith.constant 0 : index
    %c0_18 = arith.constant 0 : index
    %c0_19 = arith.constant 0 : index
    %24 = vector.load %arg2[%c0_17, %c0_18, %c0_19] : memref<1x32x128xf32, #tpu.memory_space<vmem>>, vector<1x32x128xf32>
    %25 = vector.shape_cast %24 : vector<1x32x128xf32> to vector<32x128xf32>
    %c1 = arith.constant 1 : index
    %c0_20 = arith.constant 0 : index
    %c0_21 = arith.constant 0 : index
    %26 = vector.load %arg4[%c1, %c0_20, %c0_21] : memref<2x1x128xf32, #tpu.memory_space<vmem>>, vector<1x1x128xf32>
    %27 = vector.shape_cast %26 : vector<1x1x128xf32> to vector<1x128xf32>
    %cst_22 = arith.constant 0.000000e+00 : f32
    %28 = vector.broadcast %cst_22 : f32 to vector<8x32xf32>
    %cst_23 = arith.constant 0.000000e+00 : f32
    %29 = vector.broadcast %cst_23 : f32 to vector<8x32xf32>
    %c0_i32 = arith.constant 0 : i32
    %30 = arith.index_cast %c0_i32 : i32 to index
    %c0_24 = arith.constant 0 : index
    %c0_25 = arith.constant 0 : index
    %31 = vector.load %arg7[%30, %c0_24, %c0_25] : memref<8x8x128xf32, #tpu.memory_space<vmem>>, vector<1x8x128xf32>
    %32 = vector.shape_cast %31 : vector<1x8x128xf32> to vector<8x128xf32>
    %cst_26 = arith.constant dense<0.000000e+00> : vector<8x128xf32>
    %33 = tpu.matmul %28, %23, %cst_26 {dimension_numbers = #tpu.dot_dimension_numbers<[1], [0], [0], [1], [0, 0, 1, 1], [], []>} : vector<8x32xf32>, vector<32x128xf32>, vector<8x128xf32> -> vector<8x128xf32>
    %34 = arith.addf %32, %33 : vector<8x128xf32>
    %35 = arith.mulf %34, %8 : vector<8x128xf32>
    %36 = math.tanh %35 : vector<8x128xf32>
    %37 = arith.mulf %36, %8 : vector<8x128xf32>
    %38 = arith.addf %37, %11 : vector<8x128xf32>
    %39 = vector.extract_strided_slice %38 {offsets = [0, 0], sizes = [8, 32], strides = [1, 1]} : vector<8x128xf32> to vector<8x32xf32>
    %40 = vector.extract_strided_slice %38 {offsets = [0, 32], sizes = [8, 32], strides = [1, 1]} : vector<8x128xf32> to vector<8x32xf32>
    %41 = vector.extract_strided_slice %38 {offsets = [0, 64], sizes = [8, 32], strides = [1, 1]} : vector<8x128xf32> to vector<8x32xf32>
    %42 = vector.extract_strided_slice %38 {offsets = [0, 96], sizes = [8, 32], strides = [1, 1]} : vector<8x128xf32> to vector<8x32xf32>
    %43 = arith.mulf %40, %29 : vector<8x32xf32>
    %44 = arith.mulf %39, %41 : vector<8x32xf32>
    %45 = arith.addf %43, %44 : vector<8x32xf32>
    %46 = math.tanh %45 : vector<8x32xf32>
    %47 = arith.mulf %42, %46 : vector<8x32xf32>
    %cst_27 = arith.constant dense<0.000000e+00> : vector<8x128xf32>
    %48 = tpu.matmul %47, %25, %cst_27 {dimension_numbers = #tpu.dot_dimension_numbers<[1], [0], [0], [1], [0, 0, 1, 1], [], []>} : vector<8x32xf32>, vector<32x128xf32>, vector<8x128xf32> -> vector<8x128xf32>
    %49 = vector.broadcast %27 : vector<1x128xf32> to vector<8x128xf32>
    %50 = arith.addf %48, %49 : vector<8x128xf32>
    %51 = arith.index_cast %c0_i32 : i32 to index
    %c0_28 = arith.constant 0 : index
    %c0_29 = arith.constant 0 : index
    %52 = vector.load %arg7[%51, %c0_28, %c0_29] : memref<8x8x128xf32, #tpu.memory_space<vmem>>, vector<1x8x128xf32>
    %53 = vector.shape_cast %52 : vector<1x8x128xf32> to vector<8x128xf32>
    %54 = vector.shape_cast %50 : vector<8x128xf32> to vector<1x8x128xf32>
    tpu.vector_store %arg7[%51, %c0_28, %c0_29], %54 {strides = array<i32>} : memref<8x8x128xf32, #tpu.memory_space<vmem>>, vector<1x8x128xf32>,
    %c1_i32 = arith.constant 1 : i32
    %55 = arith.index_cast %c1_i32 : i32 to index
    %c0_30 = arith.constant 0 : index
    %c0_31 = arith.constant 0 : index
    %56 = vector.load %arg7[%55, %c0_30, %c0_31] : memref<8x8x128xf32, #tpu.memory_space<vmem>>, vector<1x8x128xf32>
    %57 = vector.shape_cast %56 : vector<1x8x128xf32> to vector<8x128xf32>
    %cst_32 = arith.constant dense<0.000000e+00> : vector<8x128xf32>
    %58 = tpu.matmul %47, %23, %cst_32 {dimension_numbers = #tpu.dot_dimension_numbers<[1], [0], [0], [1], [0, 0, 1, 1], [], []>} : vector<8x32xf32>, vector<32x128xf32>, vector<8x128xf32> -> vector<8x128xf32>
    %59 = arith.addf %57, %58 : vector<8x128xf32>
    %60 = arith.mulf %59, %8 : vector<8x128xf32>
    %61 = math.tanh %60 : vector<8x128xf32>
    %62 = arith.mulf %61, %8 : vector<8x128xf32>
    %63 = arith.addf %62, %11 : vector<8x128xf32>
    %64 = vector.extract_strided_slice %63 {offsets = [0, 0], sizes = [8, 32], strides = [1, 1]} : vector<8x128xf32> to vector<8x32xf32>
    %65 = vector.extract_strided_slice %63 {offsets = [0, 32], sizes = [8, 32], strides = [1, 1]} : vector<8x128xf32> to vector<8x32xf32>
    %66 = vector.extract_strided_slice %63 {offsets = [0, 64], sizes = [8, 32], strides = [1, 1]} : vector<8x128xf32> to vector<8x32xf32>
    %67 = vector.extract_strided_slice %63 {offsets = [0, 96], sizes = [8, 32], strides = [1, 1]} : vector<8x128xf32> to vector<8x32xf32>
    %68 = arith.mulf %65, %45 : vector<8x32xf32>
    %69 = arith.mulf %64, %66 : vector<8x32xf32>
    %70 = arith.addf %68, %69 : vector<8x32xf32>
    %71 = math.tanh %70 : vector<8x32xf32>
    %72 = arith.mulf %67, %71 : vector<8x32xf32>
    %cst_33 = arith.constant dense<0.000000e+00> : vector<8x128xf32>
    %73 = tpu.matmul %72, %25, %cst_33 {dimension_numbers = #tpu.dot_dimension_numbers<[1], [0], [0], [1], [0, 0, 1, 1], [], []>} : vector<8x32xf32>, vector<32x128xf32>, vector<8x128xf32> -> vector<8x128xf32>
    %74 = vector.broadcast %27 : vector<1x128xf32> to vector<8x128xf32>
    %75 = arith.addf %73, %74 : vector<8x128xf32>
    %76 = arith.index_cast %c1_i32 : i32 to index
    %c0_34 = arith.constant 0 : index
    %c0_35 = arith.constant 0 : index
    %77 = vector.load %arg7[%76, %c0_34, %c0_35] : memref<8x8x128xf32, #tpu.memory_space<vmem>>, vector<1x8x128xf32>
    %78 = vector.shape_cast %77 : vector<1x8x128xf32> to vector<8x128xf32>
    %79 = vector.shape_cast %75 : vector<8x128xf32> to vector<1x8x128xf32>
    tpu.vector_store %arg7[%76, %c0_34, %c0_35], %79 {strides = array<i32>} : memref<8x8x128xf32, #tpu.memory_space<vmem>>, vector<1x8x128xf32>,
    %c2_i32 = arith.constant 2 : i32
    %80 = arith.index_cast %c2_i32 : i32 to index
    %c0_36 = arith.constant 0 : index
    %c0_37 = arith.constant 0 : index
    %81 = vector.load %arg7[%80, %c0_36, %c0_37] : memref<8x8x128xf32, #tpu.memory_space<vmem>>, vector<1x8x128xf32>
    %82 = vector.shape_cast %81 : vector<1x8x128xf32> to vector<8x128xf32>
    %cst_38 = arith.constant dense<0.000000e+00> : vector<8x128xf32>
    %83 = tpu.matmul %72, %23, %cst_38 {dimension_numbers = #tpu.dot_dimension_numbers<[1], [0], [0], [1], [0, 0, 1, 1], [], []>} : vector<8x32xf32>, vector<32x128xf32>, vector<8x128xf32> -> vector<8x128xf32>
    %84 = arith.addf %82, %83 : vector<8x128xf32>
    %85 = arith.mulf %84, %8 : vector<8x128xf32>
    %86 = math.tanh %85 : vector<8x128xf32>
    %87 = arith.mulf %86, %8 : vector<8x128xf32>
    %88 = arith.addf %87, %11 : vector<8x128xf32>
    %89 = vector.extract_strided_slice %88 {offsets = [0, 0], sizes = [8, 32], strides = [1, 1]} : vector<8x128xf32> to vector<8x32xf32>
    %90 = vector.extract_strided_slice %88 {offsets = [0, 32], sizes = [8, 32], strides = [1, 1]} : vector<8x128xf32> to vector<8x32xf32>
    %91 = vector.extract_strided_slice %88 {offsets = [0, 64], sizes = [8, 32], strides = [1, 1]} : vector<8x128xf32> to vector<8x32xf32>
    %92 = vector.extract_strided_slice %88 {offsets = [0, 96], sizes = [8, 32], strides = [1, 1]} : vector<8x128xf32> to vector<8x32xf32>
    %93 = arith.mulf %90, %70 : vector<8x32xf32>
    %94 = arith.mulf %89, %91 : vector<8x32xf32>
    %95 = arith.addf %93, %94 : vector<8x32xf32>
    %96 = math.tanh %95 : vector<8x32xf32>
    %97 = arith.mulf %92, %96 : vector<8x32xf32>
    %cst_39 = arith.constant dense<0.000000e+00> : vector<8x128xf32>
    %98 = tpu.matmul %97, %25, %cst_39 {dimension_numbers = #tpu.dot_dimension_numbers<[1], [0], [0], [1], [0, 0, 1, 1], [], []>} : vector<8x32xf32>, vector<32x128xf32>, vector<8x128xf32> -> vector<8x128xf32>
    %99 = vector.broadcast %27 : vector<1x128xf32> to vector<8x128xf32>
    %100 = arith.addf %98, %99 : vector<8x128xf32>
    %101 = arith.index_cast %c2_i32 : i32 to index
    %c0_40 = arith.constant 0 : index
    %c0_41 = arith.constant 0 : index
    %102 = vector.load %arg7[%101, %c0_40, %c0_41] : memref<8x8x128xf32, #tpu.memory_space<vmem>>, vector<1x8x128xf32>
    %103 = vector.shape_cast %102 : vector<1x8x128xf32> to vector<8x128xf32>
    %104 = vector.shape_cast %100 : vector<8x128xf32> to vector<1x8x128xf32>
    tpu.vector_store %arg7[%101, %c0_40, %c0_41], %104 {strides = array<i32>} : memref<8x8x128xf32, #tpu.memory_space<vmem>>, vector<1x8x128xf32>,
    %c3_i32 = arith.constant 3 : i32
    %105 = arith.index_cast %c3_i32 : i32 to index
    %c0_42 = arith.constant 0 : index
    %c0_43 = arith.constant 0 : index
    %106 = vector.load %arg7[%105, %c0_42, %c0_43] : memref<8x8x128xf32, #tpu.memory_space<vmem>>, vector<1x8x128xf32>
    %107 = vector.shape_cast %106 : vector<1x8x128xf32> to vector<8x128xf32>
    %cst_44 = arith.constant dense<0.000000e+00> : vector<8x128xf32>
    %108 = tpu.matmul %97, %23, %cst_44 {dimension_numbers = #tpu.dot_dimension_numbers<[1], [0], [0], [1], [0, 0, 1, 1], [], []>} : vector<8x32xf32>, vector<32x128xf32>, vector<8x128xf32> -> vector<8x128xf32>
    %109 = arith.addf %107, %108 : vector<8x128xf32>
    %110 = arith.mulf %109, %8 : vector<8x128xf32>
    %111 = math.tanh %110 : vector<8x128xf32>
    %112 = arith.mulf %111, %8 : vector<8x128xf32>
    %113 = arith.addf %112, %11 : vector<8x128xf32>
    %114 = vector.extract_strided_slice %113 {offsets = [0, 0], sizes = [8, 32], strides = [1, 1]} : vector<8x128xf32> to vector<8x32xf32>
    %115 = vector.extract_strided_slice %113 {offsets = [0, 32], sizes = [8, 32], strides = [1, 1]} : vector<8x128xf32> to vector<8x32xf32>
    %116 = vector.extract_strided_slice %113 {offsets = [0, 64], sizes = [8, 32], strides = [1, 1]} : vector<8x128xf32> to vector<8x32xf32>
    %117 = vector.extract_strided_slice %113 {offsets = [0, 96], sizes = [8, 32], strides = [1, 1]} : vector<8x128xf32> to vector<8x32xf32>
    %118 = arith.mulf %115, %95 : vector<8x32xf32>
    %119 = arith.mulf %114, %116 : vector<8x32xf32>
    %120 = arith.addf %118, %119 : vector<8x32xf32>
    %121 = math.tanh %120 : vector<8x32xf32>
    %122 = arith.mulf %117, %121 : vector<8x32xf32>
    %cst_45 = arith.constant dense<0.000000e+00> : vector<8x128xf32>
    %123 = tpu.matmul %122, %25, %cst_45 {dimension_numbers = #tpu.dot_dimension_numbers<[1], [0], [0], [1], [0, 0, 1, 1], [], []>} : vector<8x32xf32>, vector<32x128xf32>, vector<8x128xf32> -> vector<8x128xf32>
    %124 = vector.broadcast %27 : vector<1x128xf32> to vector<8x128xf32>
    %125 = arith.addf %123, %124 : vector<8x128xf32>
    %126 = arith.index_cast %c3_i32 : i32 to index
    %c0_46 = arith.constant 0 : index
    %c0_47 = arith.constant 0 : index
    %127 = vector.load %arg7[%126, %c0_46, %c0_47] : memref<8x8x128xf32, #tpu.memory_space<vmem>>, vector<1x8x128xf32>
    %128 = vector.shape_cast %127 : vector<1x8x128xf32> to vector<8x128xf32>
    %129 = vector.shape_cast %125 : vector<8x128xf32> to vector<1x8x128xf32>
    tpu.vector_store %arg7[%126, %c0_46, %c0_47], %129 {strides = array<i32>} : memref<8x8x128xf32, #tpu.memory_space<vmem>>, vector<1x8x128xf32>,
    %c4_i32 = arith.constant 4 : i32
    %130 = arith.index_cast %c4_i32 : i32 to index
    %c0_48 = arith.constant 0 : index
    %c0_49 = arith.constant 0 : index
    %131 = vector.load %arg7[%130, %c0_48, %c0_49] : memref<8x8x128xf32, #tpu.memory_space<vmem>>, vector<1x8x128xf32>
    %132 = vector.shape_cast %131 : vector<1x8x128xf32> to vector<8x128xf32>
    %cst_50 = arith.constant dense<0.000000e+00> : vector<8x128xf32>
    %133 = tpu.matmul %122, %23, %cst_50 {dimension_numbers = #tpu.dot_dimension_numbers<[1], [0], [0], [1], [0, 0, 1, 1], [], []>} : vector<8x32xf32>, vector<32x128xf32>, vector<8x128xf32> -> vector<8x128xf32>
    %134 = arith.addf %132, %133 : vector<8x128xf32>
    %135 = arith.mulf %134, %8 : vector<8x128xf32>
    %136 = math.tanh %135 : vector<8x128xf32>
    %137 = arith.mulf %136, %8 : vector<8x128xf32>
    %138 = arith.addf %137, %11 : vector<8x128xf32>
    %139 = vector.extract_strided_slice %138 {offsets = [0, 0], sizes = [8, 32], strides = [1, 1]} : vector<8x128xf32> to vector<8x32xf32>
    %140 = vector.extract_strided_slice %138 {offsets = [0, 32], sizes = [8, 32], strides = [1, 1]} : vector<8x128xf32> to vector<8x32xf32>
    %141 = vector.extract_strided_slice %138 {offsets = [0, 64], sizes = [8, 32], strides = [1, 1]} : vector<8x128xf32> to vector<8x32xf32>
    %142 = vector.extract_strided_slice %138 {offsets = [0, 96], sizes = [8, 32], strides = [1, 1]} : vector<8x128xf32> to vector<8x32xf32>
    %143 = arith.mulf %140, %120 : vector<8x32xf32>
    %144 = arith.mulf %139, %141 : vector<8x32xf32>
    %145 = arith.addf %143, %144 : vector<8x32xf32>
    %146 = math.tanh %145 : vector<8x32xf32>
    %147 = arith.mulf %142, %146 : vector<8x32xf32>
    %cst_51 = arith.constant dense<0.000000e+00> : vector<8x128xf32>
    %148 = tpu.matmul %147, %25, %cst_51 {dimension_numbers = #tpu.dot_dimension_numbers<[1], [0], [0], [1], [0, 0, 1, 1], [], []>} : vector<8x32xf32>, vector<32x128xf32>, vector<8x128xf32> -> vector<8x128xf32>
    %149 = vector.broadcast %27 : vector<1x128xf32> to vector<8x128xf32>
    %150 = arith.addf %148, %149 : vector<8x128xf32>
    %151 = arith.index_cast %c4_i32 : i32 to index
    %c0_52 = arith.constant 0 : index
    %c0_53 = arith.constant 0 : index
    %152 = vector.load %arg7[%151, %c0_52, %c0_53] : memref<8x8x128xf32, #tpu.memory_space<vmem>>, vector<1x8x128xf32>
    %153 = vector.shape_cast %152 : vector<1x8x128xf32> to vector<8x128xf32>
    %154 = vector.shape_cast %150 : vector<8x128xf32> to vector<1x8x128xf32>
    tpu.vector_store %arg7[%151, %c0_52, %c0_53], %154 {strides = array<i32>} : memref<8x8x128xf32, #tpu.memory_space<vmem>>, vector<1x8x128xf32>,
    %c5_i32 = arith.constant 5 : i32
    %155 = arith.index_cast %c5_i32 : i32 to index
    %c0_54 = arith.constant 0 : index
    %c0_55 = arith.constant 0 : index
    %156 = vector.load %arg7[%155, %c0_54, %c0_55] : memref<8x8x128xf32, #tpu.memory_space<vmem>>, vector<1x8x128xf32>
    %157 = vector.shape_cast %156 : vector<1x8x128xf32> to vector<8x128xf32>
    %cst_56 = arith.constant dense<0.000000e+00> : vector<8x128xf32>
    %158 = tpu.matmul %147, %23, %cst_56 {dimension_numbers = #tpu.dot_dimension_numbers<[1], [0], [0], [1], [0, 0, 1, 1], [], []>} : vector<8x32xf32>, vector<32x128xf32>, vector<8x128xf32> -> vector<8x128xf32>
    %159 = arith.addf %157, %158 : vector<8x128xf32>
    %160 = arith.mulf %159, %8 : vector<8x128xf32>
    %161 = math.tanh %160 : vector<8x128xf32>
    %162 = arith.mulf %161, %8 : vector<8x128xf32>
    %163 = arith.addf %162, %11 : vector<8x128xf32>
    %164 = vector.extract_strided_slice %163 {offsets = [0, 0], sizes = [8, 32], strides = [1, 1]} : vector<8x128xf32> to vector<8x32xf32>
    %165 = vector.extract_strided_slice %163 {offsets = [0, 32], sizes = [8, 32], strides = [1, 1]} : vector<8x128xf32> to vector<8x32xf32>
    %166 = vector.extract_strided_slice %163 {offsets = [0, 64], sizes = [8, 32], strides = [1, 1]} : vector<8x128xf32> to vector<8x32xf32>
    %167 = vector.extract_strided_slice %163 {offsets = [0, 96], sizes = [8, 32], strides = [1, 1]} : vector<8x128xf32> to vector<8x32xf32>
    %168 = arith.mulf %165, %145 : vector<8x32xf32>
    %169 = arith.mulf %164, %166 : vector<8x32xf32>
    %170 = arith.addf %168, %169 : vector<8x32xf32>
    %171 = math.tanh %170 : vector<8x32xf32>
    %172 = arith.mulf %167, %171 : vector<8x32xf32>
    %cst_57 = arith.constant dense<0.000000e+00> : vector<8x128xf32>
    %173 = tpu.matmul %172, %25, %cst_57 {dimension_numbers = #tpu.dot_dimension_numbers<[1], [0], [0], [1], [0, 0, 1, 1], [], []>} : vector<8x32xf32>, vector<32x128xf32>, vector<8x128xf32> -> vector<8x128xf32>
    %174 = vector.broadcast %27 : vector<1x128xf32> to vector<8x128xf32>
    %175 = arith.addf %173, %174 : vector<8x128xf32>
    %176 = arith.index_cast %c5_i32 : i32 to index
    %c0_58 = arith.constant 0 : index
    %c0_59 = arith.constant 0 : index
    %177 = vector.load %arg7[%176, %c0_58, %c0_59] : memref<8x8x128xf32, #tpu.memory_space<vmem>>, vector<1x8x128xf32>
    %178 = vector.shape_cast %177 : vector<1x8x128xf32> to vector<8x128xf32>
    %179 = vector.shape_cast %175 : vector<8x128xf32> to vector<1x8x128xf32>
    tpu.vector_store %arg7[%176, %c0_58, %c0_59], %179 {strides = array<i32>} : memref<8x8x128xf32, #tpu.memory_space<vmem>>, vector<1x8x128xf32>,
    %c6_i32 = arith.constant 6 : i32
    %180 = arith.index_cast %c6_i32 : i32 to index
    %c0_60 = arith.constant 0 : index
    %c0_61 = arith.constant 0 : index
    %181 = vector.load %arg7[%180, %c0_60, %c0_61] : memref<8x8x128xf32, #tpu.memory_space<vmem>>, vector<1x8x128xf32>
    %182 = vector.shape_cast %181 : vector<1x8x128xf32> to vector<8x128xf32>
    %cst_62 = arith.constant dense<0.000000e+00> : vector<8x128xf32>
    %183 = tpu.matmul %172, %23, %cst_62 {dimension_numbers = #tpu.dot_dimension_numbers<[1], [0], [0], [1], [0, 0, 1, 1], [], []>} : vector<8x32xf32>, vector<32x128xf32>, vector<8x128xf32> -> vector<8x128xf32>
    %184 = arith.addf %182, %183 : vector<8x128xf32>
    %185 = arith.mulf %184, %8 : vector<8x128xf32>
    %186 = math.tanh %185 : vector<8x128xf32>
    %187 = arith.mulf %186, %8 : vector<8x128xf32>
    %188 = arith.addf %187, %11 : vector<8x128xf32>
    %189 = vector.extract_strided_slice %188 {offsets = [0, 0], sizes = [8, 32], strides = [1, 1]} : vector<8x128xf32> to vector<8x32xf32>
    %190 = vector.extract_strided_slice %188 {offsets = [0, 32], sizes = [8, 32], strides = [1, 1]} : vector<8x128xf32> to vector<8x32xf32>
    %191 = vector.extract_strided_slice %188 {offsets = [0, 64], sizes = [8, 32], strides = [1, 1]} : vector<8x128xf32> to vector<8x32xf32>
    %192 = vector.extract_strided_slice %188 {offsets = [0, 96], sizes = [8, 32], strides = [1, 1]} : vector<8x128xf32> to vector<8x32xf32>
    %193 = arith.mulf %190, %170 : vector<8x32xf32>
    %194 = arith.mulf %189, %191 : vector<8x32xf32>
    %195 = arith.addf %193, %194 : vector<8x32xf32>
    %196 = math.tanh %195 : vector<8x32xf32>
    %197 = arith.mulf %192, %196 : vector<8x32xf32>
    %cst_63 = arith.constant dense<0.000000e+00> : vector<8x128xf32>
    %198 = tpu.matmul %197, %25, %cst_63 {dimension_numbers = #tpu.dot_dimension_numbers<[1], [0], [0], [1], [0, 0, 1, 1], [], []>} : vector<8x32xf32>, vector<32x128xf32>, vector<8x128xf32> -> vector<8x128xf32>
    %199 = vector.broadcast %27 : vector<1x128xf32> to vector<8x128xf32>
    %200 = arith.addf %198, %199 : vector<8x128xf32>
    %201 = arith.index_cast %c6_i32 : i32 to index
    %c0_64 = arith.constant 0 : index
    %c0_65 = arith.constant 0 : index
    %202 = vector.load %arg7[%201, %c0_64, %c0_65] : memref<8x8x128xf32, #tpu.memory_space<vmem>>, vector<1x8x128xf32>
    %203 = vector.shape_cast %202 : vector<1x8x128xf32> to vector<8x128xf32>
    %204 = vector.shape_cast %200 : vector<8x128xf32> to vector<1x8x128xf32>
    tpu.vector_store %arg7[%201, %c0_64, %c0_65], %204 {strides = array<i32>} : memref<8x8x128xf32, #tpu.memory_space<vmem>>, vector<1x8x128xf32>,
    %c7_i32 = arith.constant 7 : i32
    %205 = arith.index_cast %c7_i32 : i32 to index
    %c0_66 = arith.constant 0 : index
    %c0_67 = arith.constant 0 : index
    %206 = vector.load %arg7[%205, %c0_66, %c0_67] : memref<8x8x128xf32, #tpu.memory_space<vmem>>, vector<1x8x128xf32>
    %207 = vector.shape_cast %206 : vector<1x8x128xf32> to vector<8x128xf32>
    %cst_68 = arith.constant dense<0.000000e+00> : vector<8x128xf32>
    %208 = tpu.matmul %197, %23, %cst_68 {dimension_numbers = #tpu.dot_dimension_numbers<[1], [0], [0], [1], [0, 0, 1, 1], [], []>} : vector<8x32xf32>, vector<32x128xf32>, vector<8x128xf32> -> vector<8x128xf32>
    %209 = arith.addf %207, %208 : vector<8x128xf32>
    %210 = arith.mulf %209, %8 : vector<8x128xf32>
    %211 = math.tanh %210 : vector<8x128xf32>
    %212 = arith.mulf %211, %8 : vector<8x128xf32>
    %213 = arith.addf %212, %11 : vector<8x128xf32>
    %214 = vector.extract_strided_slice %213 {offsets = [0, 0], sizes = [8, 32], strides = [1, 1]} : vector<8x128xf32> to vector<8x32xf32>
    %215 = vector.extract_strided_slice %213 {offsets = [0, 32], sizes = [8, 32], strides = [1, 1]} : vector<8x128xf32> to vector<8x32xf32>
    %216 = vector.extract_strided_slice %213 {offsets = [0, 64], sizes = [8, 32], strides = [1, 1]} : vector<8x128xf32> to vector<8x32xf32>
    %217 = vector.extract_strided_slice %213 {offsets = [0, 96], sizes = [8, 32], strides = [1, 1]} : vector<8x128xf32> to vector<8x32xf32>
    %218 = arith.mulf %215, %195 : vector<8x32xf32>
    %219 = arith.mulf %214, %216 : vector<8x32xf32>
    %220 = arith.addf %218, %219 : vector<8x32xf32>
    %221 = math.tanh %220 : vector<8x32xf32>
    %222 = arith.mulf %217, %221 : vector<8x32xf32>
    %cst_69 = arith.constant dense<0.000000e+00> : vector<8x128xf32>
    %223 = tpu.matmul %222, %25, %cst_69 {dimension_numbers = #tpu.dot_dimension_numbers<[1], [0], [0], [1], [0, 0, 1, 1], [], []>} : vector<8x32xf32>, vector<32x128xf32>, vector<8x128xf32> -> vector<8x128xf32>
    %224 = vector.broadcast %27 : vector<1x128xf32> to vector<8x128xf32>
    %225 = arith.addf %223, %224 : vector<8x128xf32>
    %226 = arith.index_cast %c7_i32 : i32 to index
    %c0_70 = arith.constant 0 : index
    %c0_71 = arith.constant 0 : index
    %227 = vector.load %arg7[%226, %c0_70, %c0_71] : memref<8x8x128xf32, #tpu.memory_space<vmem>>, vector<1x8x128xf32>
    %228 = vector.shape_cast %227 : vector<1x8x128xf32> to vector<8x128xf32>
    %229 = vector.shape_cast %225 : vector<8x128xf32> to vector<1x8x128xf32>
    tpu.vector_store %arg7[%226, %c0_70, %c0_71], %229 {strides = array<i32>} : memref<8x8x128xf32, #tpu.memory_space<vmem>>, vector<1x8x128xf32>,
    %c8_i32 = arith.constant 8 : i32
    %c0_72 = arith.constant 0 : index
    %c0_73 = arith.constant 0 : index
    %c0_74 = arith.constant 0 : index
    %230 = vector.load %arg5[%c0_72, %c0_73, %c0_74] : memref<2x8x32xf32, #tpu.memory_space<vmem>>, vector<1x8x32xf32>
    %231 = vector.shape_cast %230 : vector<1x8x32xf32> to vector<8x32xf32>
    %232 = vector.shape_cast %222 : vector<8x32xf32> to vector<1x8x32xf32>
    tpu.vector_store %arg5[%c0_72, %c0_73, %c0_74], %232 {strides = array<i32>} : memref<2x8x32xf32, #tpu.memory_space<vmem>>, vector<1x8x32xf32>,
    %c0_75 = arith.constant 0 : index
    %c0_76 = arith.constant 0 : index
    %c0_77 = arith.constant 0 : index
    %233 = vector.load %arg6[%c0_75, %c0_76, %c0_77] : memref<2x8x32xf32, #tpu.memory_space<vmem>>, vector<1x8x32xf32>
    %234 = vector.shape_cast %233 : vector<1x8x32xf32> to vector<8x32xf32>
    %235 = vector.shape_cast %220 : vector<8x32xf32> to vector<1x8x32xf32>
    tpu.vector_store %arg6[%c0_75, %c0_76, %c0_77], %235 {strides = array<i32>} : memref<2x8x32xf32, #tpu.memory_space<vmem>>, vector<1x8x32xf32>,
    %c1_78 = arith.constant 1 : index
    %c0_79 = arith.constant 0 : index
    %c0_80 = arith.constant 0 : index
    %236 = vector.load %arg3[%c1_78, %c0_79, %c0_80] : memref<2x32x128xf32, #tpu.memory_space<vmem>>, vector<1x32x128xf32>
    %237 = vector.shape_cast %236 : vector<1x32x128xf32> to vector<32x128xf32>
    %cst_81 = arith.constant 0.000000e+00 : f32
    %238 = vector.broadcast %cst_81 : f32 to vector<8x32xf32>
    %cst_82 = arith.constant 0.000000e+00 : f32
    %239 = vector.broadcast %cst_82 : f32 to vector<8x32xf32>
    %c0_i32_83 = arith.constant 0 : i32
    %240 = arith.index_cast %c0_i32_83 : i32 to index
    %c0_84 = arith.constant 0 : index
    %c0_85 = arith.constant 0 : index
    %241 = vector.load %arg7[%240, %c0_84, %c0_85] : memref<8x8x128xf32, #tpu.memory_space<vmem>>, vector<1x8x128xf32>
    %242 = vector.shape_cast %241 : vector<1x8x128xf32> to vector<8x128xf32>
    %cst_86 = arith.constant dense<0.000000e+00> : vector<8x128xf32>
    %243 = tpu.matmul %238, %237, %cst_86 {dimension_numbers = #tpu.dot_dimension_numbers<[1], [0], [0], [1], [0, 0, 1, 1], [], []>} : vector<8x32xf32>, vector<32x128xf32>, vector<8x128xf32> -> vector<8x128xf32>
    %244 = arith.addf %242, %243 : vector<8x128xf32>
    %245 = arith.mulf %244, %8 : vector<8x128xf32>
    %246 = math.tanh %245 : vector<8x128xf32>
    %247 = arith.mulf %246, %8 : vector<8x128xf32>
    %248 = arith.addf %247, %11 : vector<8x128xf32>
    %249 = vector.extract_strided_slice %248 {offsets = [0, 0], sizes = [8, 32], strides = [1, 1]} : vector<8x128xf32> to vector<8x32xf32>
    %250 = vector.extract_strided_slice %248 {offsets = [0, 32], sizes = [8, 32], strides = [1, 1]} : vector<8x128xf32> to vector<8x32xf32>
    %251 = vector.extract_strided_slice %248 {offsets = [0, 64], sizes = [8, 32], strides = [1, 1]} : vector<8x128xf32> to vector<8x32xf32>
    %252 = vector.extract_strided_slice %248 {offsets = [0, 96], sizes = [8, 32], strides = [1, 1]} : vector<8x128xf32> to vector<8x32xf32>
    %253 = arith.mulf %250, %239 : vector<8x32xf32>
    %254 = arith.mulf %249, %251 : vector<8x32xf32>
    %255 = arith.addf %253, %254 : vector<8x32xf32>
    %256 = math.tanh %255 : vector<8x32xf32>
    %257 = arith.mulf %252, %256 : vector<8x32xf32>
    %c1_i32_87 = arith.constant 1 : i32
    %258 = arith.index_cast %c1_i32_87 : i32 to index
    %c0_88 = arith.constant 0 : index
    %c0_89 = arith.constant 0 : index
    %259 = vector.load %arg7[%258, %c0_88, %c0_89] : memref<8x8x128xf32, #tpu.memory_space<vmem>>, vector<1x8x128xf32>
    %260 = vector.shape_cast %259 : vector<1x8x128xf32> to vector<8x128xf32>
    %cst_90 = arith.constant dense<0.000000e+00> : vector<8x128xf32>
    %261 = tpu.matmul %257, %237, %cst_90 {dimension_numbers = #tpu.dot_dimension_numbers<[1], [0], [0], [1], [0, 0, 1, 1], [], []>} : vector<8x32xf32>, vector<32x128xf32>, vector<8x128xf32> -> vector<8x128xf32>
    %262 = arith.addf %260, %261 : vector<8x128xf32>
    %263 = arith.mulf %262, %8 : vector<8x128xf32>
    %264 = math.tanh %263 : vector<8x128xf32>
    %265 = arith.mulf %264, %8 : vector<8x128xf32>
    %266 = arith.addf %265, %11 : vector<8x128xf32>
    %267 = vector.extract_strided_slice %266 {offsets = [0, 0], sizes = [8, 32], strides = [1, 1]} : vector<8x128xf32> to vector<8x32xf32>
    %268 = vector.extract_strided_slice %266 {offsets = [0, 32], sizes = [8, 32], strides = [1, 1]} : vector<8x128xf32> to vector<8x32xf32>
    %269 = vector.extract_strided_slice %266 {offsets = [0, 64], sizes = [8, 32], strides = [1, 1]} : vector<8x128xf32> to vector<8x32xf32>
    %270 = vector.extract_strided_slice %266 {offsets = [0, 96], sizes = [8, 32], strides = [1, 1]} : vector<8x128xf32> to vector<8x32xf32>
    %271 = arith.mulf %268, %255 : vector<8x32xf32>
    %272 = arith.mulf %267, %269 : vector<8x32xf32>
    %273 = arith.addf %271, %272 : vector<8x32xf32>
    %274 = math.tanh %273 : vector<8x32xf32>
    %275 = arith.mulf %270, %274 : vector<8x32xf32>
    %c2_i32_91 = arith.constant 2 : i32
    %276 = arith.index_cast %c2_i32_91 : i32 to index
    %c0_92 = arith.constant 0 : index
    %c0_93 = arith.constant 0 : index
    %277 = vector.load %arg7[%276, %c0_92, %c0_93] : memref<8x8x128xf32, #tpu.memory_space<vmem>>, vector<1x8x128xf32>
    %278 = vector.shape_cast %277 : vector<1x8x128xf32> to vector<8x128xf32>
    %cst_94 = arith.constant dense<0.000000e+00> : vector<8x128xf32>
    %279 = tpu.matmul %275, %237, %cst_94 {dimension_numbers = #tpu.dot_dimension_numbers<[1], [0], [0], [1], [0, 0, 1, 1], [], []>} : vector<8x32xf32>, vector<32x128xf32>, vector<8x128xf32> -> vector<8x128xf32>
    %280 = arith.addf %278, %279 : vector<8x128xf32>
    %281 = arith.mulf %280, %8 : vector<8x128xf32>
    %282 = math.tanh %281 : vector<8x128xf32>
    %283 = arith.mulf %282, %8 : vector<8x128xf32>
    %284 = arith.addf %283, %11 : vector<8x128xf32>
    %285 = vector.extract_strided_slice %284 {offsets = [0, 0], sizes = [8, 32], strides = [1, 1]} : vector<8x128xf32> to vector<8x32xf32>
    %286 = vector.extract_strided_slice %284 {offsets = [0, 32], sizes = [8, 32], strides = [1, 1]} : vector<8x128xf32> to vector<8x32xf32>
    %287 = vector.extract_strided_slice %284 {offsets = [0, 64], sizes = [8, 32], strides = [1, 1]} : vector<8x128xf32> to vector<8x32xf32>
    %288 = vector.extract_strided_slice %284 {offsets = [0, 96], sizes = [8, 32], strides = [1, 1]} : vector<8x128xf32> to vector<8x32xf32>
    %289 = arith.mulf %286, %273 : vector<8x32xf32>
    %290 = arith.mulf %285, %287 : vector<8x32xf32>
    %291 = arith.addf %289, %290 : vector<8x32xf32>
    %292 = math.tanh %291 : vector<8x32xf32>
    %293 = arith.mulf %288, %292 : vector<8x32xf32>
    %c3_i32_95 = arith.constant 3 : i32
    %294 = arith.index_cast %c3_i32_95 : i32 to index
    %c0_96 = arith.constant 0 : index
    %c0_97 = arith.constant 0 : index
    %295 = vector.load %arg7[%294, %c0_96, %c0_97] : memref<8x8x128xf32, #tpu.memory_space<vmem>>, vector<1x8x128xf32>
    %296 = vector.shape_cast %295 : vector<1x8x128xf32> to vector<8x128xf32>
    %cst_98 = arith.constant dense<0.000000e+00> : vector<8x128xf32>
    %297 = tpu.matmul %293, %237, %cst_98 {dimension_numbers = #tpu.dot_dimension_numbers<[1], [0], [0], [1], [0, 0, 1, 1], [], []>} : vector<8x32xf32>, vector<32x128xf32>, vector<8x128xf32> -> vector<8x128xf32>
    %298 = arith.addf %296, %297 : vector<8x128xf32>
    %299 = arith.mulf %298, %8 : vector<8x128xf32>
    %300 = math.tanh %299 : vector<8x128xf32>
    %301 = arith.mulf %300, %8 : vector<8x128xf32>
    %302 = arith.addf %301, %11 : vector<8x128xf32>
    %303 = vector.extract_strided_slice %302 {offsets = [0, 0], sizes = [8, 32], strides = [1, 1]} : vector<8x128xf32> to vector<8x32xf32>
    %304 = vector.extract_strided_slice %302 {offsets = [0, 32], sizes = [8, 32], strides = [1, 1]} : vector<8x128xf32> to vector<8x32xf32>
    %305 = vector.extract_strided_slice %302 {offsets = [0, 64], sizes = [8, 32], strides = [1, 1]} : vector<8x128xf32> to vector<8x32xf32>
    %306 = vector.extract_strided_slice %302 {offsets = [0, 96], sizes = [8, 32], strides = [1, 1]} : vector<8x128xf32> to vector<8x32xf32>
    %307 = arith.mulf %304, %291 : vector<8x32xf32>
    %308 = arith.mulf %303, %305 : vector<8x32xf32>
    %309 = arith.addf %307, %308 : vector<8x32xf32>
    %310 = math.tanh %309 : vector<8x32xf32>
    %311 = arith.mulf %306, %310 : vector<8x32xf32>
    %c4_i32_99 = arith.constant 4 : i32
    %312 = arith.index_cast %c4_i32_99 : i32 to index
    %c0_100 = arith.constant 0 : index
    %c0_101 = arith.constant 0 : index
    %313 = vector.load %arg7[%312, %c0_100, %c0_101] : memref<8x8x128xf32, #tpu.memory_space<vmem>>, vector<1x8x128xf32>
    %314 = vector.shape_cast %313 : vector<1x8x128xf32> to vector<8x128xf32>
    %cst_102 = arith.constant dense<0.000000e+00> : vector<8x128xf32>
    %315 = tpu.matmul %311, %237, %cst_102 {dimension_numbers = #tpu.dot_dimension_numbers<[1], [0], [0], [1], [0, 0, 1, 1], [], []>} : vector<8x32xf32>, vector<32x128xf32>, vector<8x128xf32> -> vector<8x128xf32>
    %316 = arith.addf %314, %315 : vector<8x128xf32>
    %317 = arith.mulf %316, %8 : vector<8x128xf32>
    %318 = math.tanh %317 : vector<8x128xf32>
    %319 = arith.mulf %318, %8 : vector<8x128xf32>
    %320 = arith.addf %319, %11 : vector<8x128xf32>
    %321 = vector.extract_strided_slice %320 {offsets = [0, 0], sizes = [8, 32], strides = [1, 1]} : vector<8x128xf32> to vector<8x32xf32>
    %322 = vector.extract_strided_slice %320 {offsets = [0, 32], sizes = [8, 32], strides = [1, 1]} : vector<8x128xf32> to vector<8x32xf32>
    %323 = vector.extract_strided_slice %320 {offsets = [0, 64], sizes = [8, 32], strides = [1, 1]} : vector<8x128xf32> to vector<8x32xf32>
    %324 = vector.extract_strided_slice %320 {offsets = [0, 96], sizes = [8, 32], strides = [1, 1]} : vector<8x128xf32> to vector<8x32xf32>
    %325 = arith.mulf %322, %309 : vector<8x32xf32>
    %326 = arith.mulf %321, %323 : vector<8x32xf32>
    %327 = arith.addf %325, %326 : vector<8x32xf32>
    %328 = math.tanh %327 : vector<8x32xf32>
    %329 = arith.mulf %324, %328 : vector<8x32xf32>
    %c5_i32_103 = arith.constant 5 : i32
    %330 = arith.index_cast %c5_i32_103 : i32 to index
    %c0_104 = arith.constant 0 : index
    %c0_105 = arith.constant 0 : index
    %331 = vector.load %arg7[%330, %c0_104, %c0_105] : memref<8x8x128xf32, #tpu.memory_space<vmem>>, vector<1x8x128xf32>
    %332 = vector.shape_cast %331 : vector<1x8x128xf32> to vector<8x128xf32>
    %cst_106 = arith.constant dense<0.000000e+00> : vector<8x128xf32>
    %333 = tpu.matmul %329, %237, %cst_106 {dimension_numbers = #tpu.dot_dimension_numbers<[1], [0], [0], [1], [0, 0, 1, 1], [], []>} : vector<8x32xf32>, vector<32x128xf32>, vector<8x128xf32> -> vector<8x128xf32>
    %334 = arith.addf %332, %333 : vector<8x128xf32>
    %335 = arith.mulf %334, %8 : vector<8x128xf32>
    %336 = math.tanh %335 : vector<8x128xf32>
    %337 = arith.mulf %336, %8 : vector<8x128xf32>
    %338 = arith.addf %337, %11 : vector<8x128xf32>
    %339 = vector.extract_strided_slice %338 {offsets = [0, 0], sizes = [8, 32], strides = [1, 1]} : vector<8x128xf32> to vector<8x32xf32>
    %340 = vector.extract_strided_slice %338 {offsets = [0, 32], sizes = [8, 32], strides = [1, 1]} : vector<8x128xf32> to vector<8x32xf32>
    %341 = vector.extract_strided_slice %338 {offsets = [0, 64], sizes = [8, 32], strides = [1, 1]} : vector<8x128xf32> to vector<8x32xf32>
    %342 = vector.extract_strided_slice %338 {offsets = [0, 96], sizes = [8, 32], strides = [1, 1]} : vector<8x128xf32> to vector<8x32xf32>
    %343 = arith.mulf %340, %327 : vector<8x32xf32>
    %344 = arith.mulf %339, %341 : vector<8x32xf32>
    %345 = arith.addf %343, %344 : vector<8x32xf32>
    %346 = math.tanh %345 : vector<8x32xf32>
    %347 = arith.mulf %342, %346 : vector<8x32xf32>
    %c6_i32_107 = arith.constant 6 : i32
    %348 = arith.index_cast %c6_i32_107 : i32 to index
    %c0_108 = arith.constant 0 : index
    %c0_109 = arith.constant 0 : index
    %349 = vector.load %arg7[%348, %c0_108, %c0_109] : memref<8x8x128xf32, #tpu.memory_space<vmem>>, vector<1x8x128xf32>
    %350 = vector.shape_cast %349 : vector<1x8x128xf32> to vector<8x128xf32>
    %cst_110 = arith.constant dense<0.000000e+00> : vector<8x128xf32>
    %351 = tpu.matmul %347, %237, %cst_110 {dimension_numbers = #tpu.dot_dimension_numbers<[1], [0], [0], [1], [0, 0, 1, 1], [], []>} : vector<8x32xf32>, vector<32x128xf32>, vector<8x128xf32> -> vector<8x128xf32>
    %352 = arith.addf %350, %351 : vector<8x128xf32>
    %353 = arith.mulf %352, %8 : vector<8x128xf32>
    %354 = math.tanh %353 : vector<8x128xf32>
    %355 = arith.mulf %354, %8 : vector<8x128xf32>
    %356 = arith.addf %355, %11 : vector<8x128xf32>
    %357 = vector.extract_strided_slice %356 {offsets = [0, 0], sizes = [8, 32], strides = [1, 1]} : vector<8x128xf32> to vector<8x32xf32>
    %358 = vector.extract_strided_slice %356 {offsets = [0, 32], sizes = [8, 32], strides = [1, 1]} : vector<8x128xf32> to vector<8x32xf32>
    %359 = vector.extract_strided_slice %356 {offsets = [0, 64], sizes = [8, 32], strides = [1, 1]} : vector<8x128xf32> to vector<8x32xf32>
    %360 = vector.extract_strided_slice %356 {offsets = [0, 96], sizes = [8, 32], strides = [1, 1]} : vector<8x128xf32> to vector<8x32xf32>
    %361 = arith.mulf %358, %345 : vector<8x32xf32>
    %362 = arith.mulf %357, %359 : vector<8x32xf32>
    %363 = arith.addf %361, %362 : vector<8x32xf32>
    %364 = math.tanh %363 : vector<8x32xf32>
    %365 = arith.mulf %360, %364 : vector<8x32xf32>
    %c7_i32_111 = arith.constant 7 : i32
    %366 = arith.index_cast %c7_i32_111 : i32 to index
    %c0_112 = arith.constant 0 : index
    %c0_113 = arith.constant 0 : index
    %367 = vector.load %arg7[%366, %c0_112, %c0_113] : memref<8x8x128xf32, #tpu.memory_space<vmem>>, vector<1x8x128xf32>
    %368 = vector.shape_cast %367 : vector<1x8x128xf32> to vector<8x128xf32>
    %cst_114 = arith.constant dense<0.000000e+00> : vector<8x128xf32>
    %369 = tpu.matmul %365, %237, %cst_114 {dimension_numbers = #tpu.dot_dimension_numbers<[1], [0], [0], [1], [0, 0, 1, 1], [], []>} : vector<8x32xf32>, vector<32x128xf32>, vector<8x128xf32> -> vector<8x128xf32>
    %370 = arith.addf %368, %369 : vector<8x128xf32>
    %371 = arith.mulf %370, %8 : vector<8x128xf32>
    %372 = math.tanh %371 : vector<8x128xf32>
    %373 = arith.mulf %372, %8 : vector<8x128xf32>
    %374 = arith.addf %373, %11 : vector<8x128xf32>
    %375 = vector.extract_strided_slice %374 {offsets = [0, 0], sizes = [8, 32], strides = [1, 1]} : vector<8x128xf32> to vector<8x32xf32>
    %376 = vector.extract_strided_slice %374 {offsets = [0, 32], sizes = [8, 32], strides = [1, 1]} : vector<8x128xf32> to vector<8x32xf32>
    %377 = vector.extract_strided_slice %374 {offsets = [0, 64], sizes = [8, 32], strides = [1, 1]} : vector<8x128xf32> to vector<8x32xf32>
    %378 = vector.extract_strided_slice %374 {offsets = [0, 96], sizes = [8, 32], strides = [1, 1]} : vector<8x128xf32> to vector<8x32xf32>
    %379 = arith.mulf %376, %363 : vector<8x32xf32>
    %380 = arith.mulf %375, %377 : vector<8x32xf32>
    %381 = arith.addf %379, %380 : vector<8x32xf32>
    %382 = math.tanh %381 : vector<8x32xf32>
    %383 = arith.mulf %378, %382 : vector<8x32xf32>
    %c8_i32_115 = arith.constant 8 : i32
    %c1_116 = arith.constant 1 : index
    %c0_117 = arith.constant 0 : index
    %c0_118 = arith.constant 0 : index
    %384 = vector.load %arg5[%c1_116, %c0_117, %c0_118] : memref<2x8x32xf32, #tpu.memory_space<vmem>>, vector<1x8x32xf32>
    %385 = vector.shape_cast %384 : vector<1x8x32xf32> to vector<8x32xf32>
    %386 = vector.shape_cast %383 : vector<8x32xf32> to vector<1x8x32xf32>
    tpu.vector_store %arg5[%c1_116, %c0_117, %c0_118], %386 {strides = array<i32>} : memref<2x8x32xf32, #tpu.memory_space<vmem>>, vector<1x8x32xf32>,
    %c1_119 = arith.constant 1 : index
    %c0_120 = arith.constant 0 : index
    %c0_121 = arith.constant 0 : index
    %387 = vector.load %arg6[%c1_119, %c0_120, %c0_121] : memref<2x8x32xf32, #tpu.memory_space<vmem>>, vector<1x8x32xf32>
    %388 = vector.shape_cast %387 : vector<1x8x32xf32> to vector<8x32xf32>
    %389 = vector.shape_cast %381 : vector<8x32xf32> to vector<1x8x32xf32>
    tpu.vector_store %arg6[%c1_119, %c0_120, %c0_121], %389 {strides = array<i32>} : memref<2x8x32xf32, #tpu.memory_space<vmem>>, vector<1x8x32xf32>,
    return
  }
}

</mosaic_0001>

<bundles_post_ra>
// kernel: encoder_forward.1
= control target key start
LH: loop header
LB: loop body
LE: loop exit
PB: predicated region body
PF: predicated region fallthrough
CT: control target
= control target key end

     0   :  { %vm48_vm0 = vcmask 261120   ;;  %v3074_v3 = vmov 0.0|0.0   ;;  %vm3075_vm1 = vmmov 0   ;;  %v3076_v4 = vmov 0.0   ;;  %s3079_s30 = smov 32   ;;  %s3558_s1 = inlined_call_operand.vmem [shape: f32[32,128], index: 1, kind: input, shape index: {}]   ;;  %s3559_s0 = inlined_call_operand.vmem [shape: f32[8,8,32], index: 0, kind: input, shape index: {}]   ;;  %s3560_s3 = inlined_call_operand.vmem [shape: f32[2,32,128], index: 3, kind: input, shape index: {}]   ;;  %s3561_s4 = inlined_call_operand.vmem [shape: f32[2,1,128], index: 4, kind: input, shape index: {}]   ;;  %s3562_s2 = inlined_call_operand.vmem [shape: f32[1,32,128], index: 2, kind: input, shape index: {}]   ;;  %s3563_s5 = inlined_call_operand.vmem [shape: f32[2,8,32], index: 5, kind: output, shape index: {0}]   ;;  %s3564_s6 = inlined_call_operand.vmem [shape: f32[2,8,32], index: 6, kind: output, shape index: {1}]  }
   0x1   :  { %v37_v0 = vld [vmem:[%s3558_s1] sm:$0xff]  ;;  %v38_v1 = vld [vmem:[%s3558_s1 + $0x8] sm:$0xff]  ;;  %v39_v2 = vld [vmem:[%s3558_s1 + $0x10] sm:$0xff]  ;;  %2880 = vmatprep.subr.bf16.mxu1 %v3074_v3  ;;  %2651 = vmatprep.mubr.msk.f32.mxu1 %vm3075_vm1, %v3076_v4  ;;  %v22_v26 = vlaneseq  ;;  %v3077_v41 = vmov 0.5  }
   0x2   :  { %v2830_v5 = vpack.c.bf16 %v38_v1, %v37_v0  ;;  %v40_v6 = vld [vmem:[%s3558_s1 + $0x18] sm:$0xff]  ;;  %v29_v7 = vld [vmem:[%s3559_s0] sm:$0xff]  ;;  %v187_v10 = vld [vmem:[%s3560_s3 + $0x8] sm:$0xff] }
   0x3   :  { %v2834_v8 = vpack.c.bf16 %v40_v6, %v39_v2  ;;  %2554 = vmatprep.mubr.msk.f32.mxu0 %vm48_vm0, %v29_v7  ;;  %v186_v9 = vld [vmem:[%s3560_s3] sm:$0xff]  ;;  %v30_v11 = vld [vmem:[%s3559_s0 + $0x8] sm:$0xff]  ;;  %v31_v13 = vld [vmem:[%s3559_s0 + $0x10] sm:$0xff]  ;;  %v23_v31 = vand.u32 127, %v22_v26 }
   0x4   :  { %2831 = vmatprep.subr.bf16.mxu0 %v2830_v5  ;;  %v3144_v12 = vpack.c.bf16 %v187_v10, %v186_v9  ;;  %v188_v14 = vld [vmem:[%s3560_s3 + $0x10] sm:$0xff]  ;;  %v189_v15 = vld [vmem:[%s3560_s3 + $0x18] sm:$0xff]  ;;  %v33_v18 = vld [vmem:[%s3559_s0 + $0x20] sm:$0xff] }
   0x5   :  { %2833 = vmatpush3.bf16.msra.mxu0 %v2830_v5  ;;  %v32_v16 = vld [vmem:[%s3559_s0 + $0x18] sm:$0xff]  ;;  %v3162_v17 = vpack.c.bf16 %v189_v15, %v188_v14  ;;  %v34_v19 = vld [vmem:[%s3559_s0 + $0x28] sm:$0xff]  ;;  %v35_v20 = vld [vmem:[%s3559_s0 + $0x30] sm:$0xff]  ;;  %vm24_vm2 = vcmp.ge.s32.totalorder %v23_v31, 64  ;;  %vm25_vm3 = vcmp.lt.s32.totalorder %v23_v31, 96 }
   0x6   :  { %2835 = vmatprep.subr.bf16.mxu0 %v2834_v8  ;;  %v36_v21 = vld [vmem:[%s3559_s0 + $0x38] sm:$0xff]  ;;  %v2375_v22 = vld [vmem:[%s3561_s4] ss:$0 sm:$0xff]  ;;  %vm26_vm4 = vmand %vm24_vm2, %vm25_vm3  ;;  %s3078_s0 = smov 64  }
   0x7   :  { %v3206_v42 = vsel %vm26_vm4, 1.0, %v3077_v41  ;;  %v3209_v48 = vsel %vm26_vm4, 0.0, %v3077_v41  ;;  %v190_v56 = vld [vmem:[%s3562_s2] sm:$0xff]  ;;  %v191_v57 = vld [vmem:[%s3562_s2 + $0x8] sm:$0xff]  ;;  %v192_v58 = vld [vmem:[%s3562_s2 + $0x10] sm:$0xff] }
   0x8   :  { %v3224_v59 = vpack.c.bf16 %v191_v57, %v190_v56  ;;  %v193_v60 = vld [vmem:[%s3562_s2 + $0x18] sm:$0xff] }
   0x9   :  { %2837 = vmatpush3.bf16.msra.mxu0 %v2834_v8  ;;  %v3230_v61 = vpack.c.bf16 %v193_v60, %v192_v58 }
   0xa   :  { %2838 = vmatprep.subr.bf16.mxu0 %v3074_v3  ;;  %2882 = vmatpush3.bf16.msra.mxu1 %v3224_v59 }
   0xb   :  { %2883 = vmatprep.subr.bf16.mxu1 %v3074_v3 }
   0xc   :  { %2555 = vmatmul.mubr.msk.f32.vlgmr.msra.gmra.mrb[0].mxu0 %vm48_vm0, %v30_v11 }
   0xd   :  { %2840 = vmatpush3.bf16.msra.mxu0 %v3144_v12  ;;  %2557 = vmatprep.mubr.msk.f32.mxu0 %vm48_vm0, %v31_v13 }
   0xe   :  { %2841 = vmatprep.subr.bf16.mxu0 %v3074_v3  ;;  %2885 = vmatpush3.bf16.msra.mxu1 %v3230_v61 }
   0xf   :  { %2892 = vmatprep.subr.bf16.mxu1 %v3074_v3 }
  0x10   :  { %2558 = vmatmul.mubr.msk.f32.gmra.mrb[2].mxu0 %vm48_vm0, %v32_v16 }
  0x11   :  { %2560 = vmatprep.mubr.msk.f32.mxu0 %vm48_vm0, %v33_v18  ;;  %2843 = vmatpush3.bf16.msra.mxu0 %v3162_v17 }
  0x12   :  { %2844 = vmatprep.subr.bf16.mxu0 %v3074_v3 }
  0x14   :  { %2561 = vmatmul.mubr.msk.f32.gmra.mrb[4].mxu0 %vm48_vm0, %v34_v19 }
  0x15   :  { %2563 = vmatprep.mubr.msk.f32.mxu0 %vm48_vm0, %v35_v20 }
  0x18   :  { %2564 = vmatmul.mubr.msk.f32.gmra.mrb[6].mxu0 %vm48_vm0, %v36_v21 }
  0x19   :  { %2574 = vmatprep.mubr.msk.f32.mxu0 %vm3075_vm1, %v3076_v4 }
  0x1c   :  { %2575 = vmatmul.mubr.f32.vlgmr.msra.gmra.mrb[8].mxu0 %v3076_v4 }
  0x1d   :  { %2585 = vmatprep.mubr.msk.f32.mxu0 %vm3075_vm1, %v3076_v4  ;;  %2846 = vmatpush3.bf16.msra.mxu0 %v3224_v59 }
  0x1e   :  { %2847 = vmatprep.subr.bf16.mxu0 %v3074_v3 }
  0x21   :  { %2849 = vmatpush3.bf16.msra.mxu0 %v3230_v61 }
  0x22   :  { %2850 = vmatprep.subr.bf16.mxu0 %v3074_v3 }
  0xdf   :  { %v2556_v23 = vpop.f32.mrb[0].mxu0 }
  0xe0   :  { %v3192_v24 = vadd.f32 %v2556_v23, %v2375_v22  ;;  %v139_v25 = vpop.f32.mrb[1].mxu0 }
  0xe1   :  { %v140_v40 = vadd.f32 %v2375_v22, %v139_v25 }
  0xe3   :  { %v2559_v27 = vpop.f32.mrb[2].mxu0 }
  0xe4   :  { %v3194_v28 = vadd.f32 %v2559_v27, %v2375_v22  ;;  %v149_v29 = vpop.f32.mrb[3].mxu0 }
  0xe5   :  { %v3196_v30 = vadd.f32 %v2375_v22, %v149_v29 }
  0xe7   :  { %v2562_v32 = vpop.f32.mrb[4].mxu0 }
  0xe8   :  { %v3198_v33 = vadd.f32 %v2562_v32, %v2375_v22  ;;  %v159_v34 = vpop.f32.mrb[5].mxu0 }
  0xe9   :  { %v3200_v35 = vadd.f32 %v2375_v22, %v159_v34 }
  0xeb   :  { %v2565_v36 = vpop.f32.mrb[6].mxu0 }
  0xec   :  { %v3202_v37 = vadd.f32 %v2565_v36, %v2375_v22  ;;  %v169_v38 = vpop.f32.mrb[7].mxu0 }
  0xed   :  { %v3204_v39 = vadd.f32 %v2375_v22, %v169_v38 }
  0xef   :  { %v266_v43 = vpop.f32.mrb[8].mxu0 }
  0xf0   :  { %v270_v44 = vadd.f32 %v266_v43, %v140_v40  ;;  %v2576_v45 = vpop.f32.mrb[9].mxu0 }
  0xf2   :  { %v271_v46 = vmul.f32 %v270_v44, %v3206_v42 }
  0xf4   :  { %3010 = vtanh.f32 %v271_v46 }
  0xfe   :  { %v3011_v47 = vpop.eup %3010 }
  0xff   :  { %v273_v49 = vmul.f32 %v3011_v47, %v3206_v42 }
 0x101   :  { %v274_v50 = vadd.f32 %v273_v49, %v3209_v48 }
 0x103   :  { %277 = vrot.lane.b32.xlu0 %v274_v50, %s3078_s0  ;;  %v275_v53 = vmul.f32 0.0, %v274_v50 }
 0x175   :  { %v278_v51 = vpop.permute.xlu0 %277 }
 0x176   :  { %v280_v52 = vmul.f32 %v278_v51, %v274_v50 }
 0x178   :  { %282 = vrot.lane.b32.xlu0 %v280_v52, %s3079_s30 }
 0x1ea   :  { %v283_v54 = vpop.permute.xlu0 %282 }
 0x1eb   :  { %v285_v55 = vadd.f32 %v283_v54, %v275_v53 }
 0x1ed   :  { %3012 = vtanh.f32 %v285_v55 }
 0x1f7   :  { %v3013_v62 = vpop.eup %3012 }
 0x1f8   :  { %288 = vrot.lane.b32.xlu1 %v3013_v62, %s3078_s0 }
 0x26a   :  { %v289_v63 = vpop.permute.xlu1 %288 }
 0x26b   :  { %v291_v0 = vmul.f32 %v289_v63, %v274_v50 }
 0x26d   :  { %299 = vrot.lane.b32.xlu1 %v291_v0, %s3079_s30 }
 0x2df   :  { %v300_v1 = vpop.permute.xlu1 %299 }
 0x2e0   :  { %2586 = vmatmul.mubr.msk.f32.vlgmr.msra.gmra.mrb[10].mxu0 %vm48_vm0, %v300_v1 }
 0x2e1   :  { %2852 = vmatpush3.bf16.msra.mxu0 %v3144_v12  ;;  %2596 = vmatprep.mubr.msk.f32.mxu0 %vm3075_vm1, %v3076_v4 }
 0x2e2   :  { %2853 = vmatprep.subr.bf16.mxu0 %v3074_v3 }
 0x2e5   :  { %2855 = vmatpush3.bf16.msra.mxu0 %v3162_v17 }
 0x2e6   :  { %2856 = vmatprep.subr.bf16.mxu0 %v3074_v3 }
 0x2e8   :  { %2597 = vmatmul.mubr.msk.f32.vlgmr.msra.gmra.mrb[12].mxu0 %vm48_vm0, %v300_v1 }
 0x2e9   :  { %2858 = vmatpush3.bf16.msra.mxu0 %v3224_v59  ;;  %2607 = vmatprep.mubr.msk.f32.mxu0 %vm3075_vm1, %v3076_v4 }
 0x2ea   :  { %2859 = vmatprep.subr.bf16.mxu0 %v3074_v3 }
 0x2ed   :  { %2861 = vmatpush3.bf16.msra.mxu0 %v3230_v61 }
 0x2ee   :  { %2862 = vmatprep.subr.bf16.mxu0 %v3074_v3 }
 0x3b3   :  { %v3255_v2 = vpop.f32.mrb[10].mxu0 }
 0x3b4   :  { %v2587_v5 = vpop.f32.mrb[11].mxu0 }
 0x3bb   :  { %v442_v6 = vpop.f32.mrb[12].mxu0 }
 0x3bc   :  { %v446_v7 = vadd.f32 %v442_v6, %v3192_v24  ;;  %v2598_v8 = vpop.f32.mrb[13].mxu0 }
 0x3be   :  { %v447_v9 = vmul.f32 %v446_v7, %v3206_v42 }
 0x3c0   :  { %3014 = vtanh.f32 %v447_v9 }
 0x3ca   :  { %v3015_v10 = vpop.eup %3014 }
 0x3cb   :  { %v449_v11 = vmul.f32 %v3015_v10, %v3206_v42 }
 0x3cd   :  { %v450_v13 = vadd.f32 %v449_v11, %v3209_v48 }
 0x3cf   :  { %453 = vrot.lane.b32.xlu0 %v450_v13, %s3078_s0  ;;  %v451_v16 = vmul.f32 %v450_v13, %v285_v55 }
 0x441   :  { %v454_v14 = vpop.permute.xlu0 %453 }
 0x442   :  { %v456_v15 = vmul.f32 %v454_v14, %v450_v13 }
 0x444   :  { %458 = vrot.lane.b32.xlu1 %v456_v15, %s3079_s30 }
 0x4b6   :  { %v459_v18 = vpop.permute.xlu1 %458 }
 0x4b7   :  { %v461_v19 = vadd.f32 %v459_v18, %v451_v16 }
 0x4b9   :  { %3016 = vtanh.f32 %v461_v19 }
 0x4c3   :  { %v3017_v20 = vpop.eup %3016 }
 0x4c4   :  { %464 = vrot.lane.b32.xlu0 %v3017_v20, %s3078_s0 }
 0x536   :  { %v465_v21 = vpop.permute.xlu0 %464 }
 0x537   :  { %v467_v22 = vmul.f32 %v465_v21, %v450_v13 }
 0x539   :  { %469 = vrot.lane.b32.xlu1 %v467_v22, %s3079_s30 }
 0x5ab   :  { %v470_v23 = vpop.permute.xlu1 %469 }
 0x5ac   :  { %2608 = vmatmul.mubr.msk.f32.vlgmr.msra.gmra.mrb[14].mxu0 %vm48_vm0, %v470_v23 }
 0x5ad   :  { %2864 = vmatpush3.bf16.msra.mxu0 %v3144_v12  ;;  %2618 = vmatprep.mubr.msk.f32.mxu0 %vm3075_vm1, %v3076_v4 }
 0x5ae   :  { %2865 = vmatprep.subr.bf16.mxu0 %v3074_v3 }
 0x5b1   :  { %2867 = vmatpush3.bf16.msra.mxu0 %v3162_v17 }
 0x5b2   :  { %2868 = vmatprep.subr.bf16.mxu0 %v3074_v3 }
 0x5b4   :  { %2619 = vmatmul.mubr.msk.f32.vlgmr.msra.gmra.mrb[16].mxu0 %vm48_vm0, %v470_v23 }
 0x5b5   :  { %2870 = vmatpush3.bf16.msra.mxu0 %v3224_v59  ;;  %2629 = vmatprep.mubr.msk.f32.mxu0 %vm3075_vm1, %v3076_v4 }
 0x5b6   :  { %2871 = vmatprep.subr.bf16.mxu0 %v3074_v3 }
 0x5b9   :  { %2873 = vmatpush3.bf16.msra.mxu0 %v3230_v61 }
 0x5ba   :  { %2874 = vmatprep.subr.bf16.mxu0 %v3074_v3 }
 0x67f   :  { %v3279_v24 = vpop.f32.mrb[14].mxu0 }
 0x680   :  { %v2609_v25 = vpop.f32.mrb[15].mxu0 }
 0x687   :  { %v612_v26 = vpop.f32.mrb[16].mxu0 }
 0x688   :  { %v616_v27 = vadd.f32 %v612_v26, %v3196_v30  ;;  %v2620_v29 = vpop.f32.mrb[17].mxu0 }
 0x68a   :  { %v617_v31 = vmul.f32 %v616_v27, %v3206_v42 }
 0x68c   :  { %3018 = vtanh.f32 %v617_v31 }
 0x696   :  { %v3019_v32 = vpop.eup %3018 }
 0x697   :  { %v619_v34 = vmul.f32 %v3019_v32, %v3206_v42 }
 0x699   :  { %v620_v36 = vadd.f32 %v619_v34, %v3209_v48 }
 0x69b   :  { %623 = vrot.lane.b32.xlu0 %v620_v36, %s3078_s0  ;;  %v621_v41 = vmul.f32 %v620_v36, %v461_v19 }
 0x70d   :  { %v624_v38 = vpop.permute.xlu0 %623 }
 0x70e   :  { %v626_v40 = vmul.f32 %v624_v38, %v620_v36 }
 0x710   :  { %628 = vrot.lane.b32.xlu1 %v626_v40, %s3079_s30 }
 0x782   :  { %v629_v43 = vpop.permute.xlu1 %628 }
 0x783   :  { %v631_v44 = vadd.f32 %v629_v43, %v621_v41 }
 0x785   :  { %3020 = vtanh.f32 %v631_v44 }
 0x78f   :  { %v3021_v30 = vpop.eup %3020 }
 0x790   :  { %634 = vrot.lane.b32.xlu0 %v3021_v30, %s3078_s0 }
 0x802   :  { %v635_v45 = vpop.permute.xlu0 %634 }
 0x803   :  { %v637_v46 = vmul.f32 %v635_v45, %v620_v36 }
 0x805   :  { %639 = vrot.lane.b32.xlu1 %v637_v46, %s3079_s30 }
 0x877   :  { %v640_v47 = vpop.permute.xlu1 %639 }
 0x878   :  { %2630 = vmatmul.mubr.msk.f32.vlgmr.msra.gmra.mrb[18].mxu0 %vm48_vm0, %v640_v47 }
 0x879   :  { %2876 = vmatpush3.bf16.msra.mxu0 %v3144_v12  ;;  %2640 = vmatprep.mubr.msk.f32.mxu0 %vm3075_vm1, %v3076_v4 }
 0x87a   :  { %2877 = vmatprep.subr.bf16.mxu0 %v3074_v3 }
 0x87d   :  { %2879 = vmatpush3.bf16.msra.mxu0 %v3162_v17 }
 0x87e   :  { %2886 = vmatprep.subr.bf16.mxu0 %v3074_v3 }
 0x880   :  { %2641 = vmatmul.mubr.msk.f32.vlgmr.msra.gmra.mrb[20].mxu0 %vm48_vm0, %v640_v47 }
 0x881   :  { %2888 = vmatpush3.bf16.msra.mxu0 %v3144_v12  ;;  %2662 = vmatprep.mubr.msk.f32.mxu0 %vm3075_vm1, %v3076_v4 }
 0x882   :  { %2889 = vmatprep.subr.bf16.mxu0 %v3074_v3 }
 0x885   :  { %2891 = vmatpush3.bf16.msra.mxu0 %v3162_v17 }
 0x886   :  { %2898 = vmatprep.subr.bf16.mxu0 %v3074_v3 }
 0x94b   :  { %v3303_v49 = vpop.f32.mrb[18].mxu0 }
 0x94c   :  { %v2631_v50 = vpop.f32.mrb[19].mxu0 }
 0x953   :  { %v782_v51 = vpop.f32.mrb[20].mxu0 }
 0x954   :  { %v786_v52 = vadd.f32 %v782_v51, %v3194_v28  ;;  %v2642_v53 = vpop.f32.mrb[21].mxu0 }
 0x956   :  { %v787_v54 = vmul.f32 %v786_v52, %v3206_v42 }
 0x958   :  { %3022 = vtanh.f32 %v787_v54 }
 0x962   :  { %v3023_v55 = vpop.eup %3022 }
 0x963   :  { %v789_v56 = vmul.f32 %v3023_v55, %v3206_v42 }
 0x965   :  { %v790_v57 = vadd.f32 %v789_v56, %v3209_v48 }
 0x967   :  { %793 = vrot.lane.b32.xlu0 %v790_v57, %s3078_s0  ;;  %v791_v62 = vmul.f32 %v790_v57, %v631_v44 }
 0x9d9   :  { %v794_v58 = vpop.permute.xlu0 %793 }
 0x9da   :  { %v796_v60 = vmul.f32 %v794_v58, %v790_v57 }
 0x9dc   :  { %798 = vrot.lane.b32.xlu1 %v796_v60, %s3079_s30 }
 0xa4e   :  { %v799_v63 = vpop.permute.xlu1 %798 }
 0xa4f   :  { %v801_v0 = vadd.f32 %v799_v63, %v791_v62 }
 0xa51   :  { %3024 = vtanh.f32 %v801_v0 }
 0xa5b   :  { %v3025_v28 = vpop.eup %3024 }
 0xa5c   :  { %804 = vrot.lane.b32.xlu0 %v3025_v28, %s3078_s0 }
 0xace   :  { %v805_v1 = vpop.permute.xlu0 %804 }
 0xacf   :  { %v807_v5 = vmul.f32 %v805_v1, %v790_v57 }
 0xad1   :  { %809 = vrot.lane.b32.xlu1 %v807_v5, %s3079_s30 }
 0xb43   :  { %v810_v6 = vpop.permute.xlu1 %809 }
 0xb44   :  { %2652 = vmatmul.mubr.msk.f32.vlgmr.msra.gmra.mrb[0].mxu1 %vm48_vm0, %v810_v6  ;;  %2663 = vmatmul.mubr.msk.f32.vlgmr.msra.gmra.mrb[22].mxu0 %vm48_vm0, %v810_v6 }
 0xb45   :  { %2894 = vmatpush3.bf16.msra.mxu1 %v3224_v59  ;;  %2900 = vmatpush3.bf16.msra.mxu0 %v3144_v12 }
 0xb46   :  { %2895 = vmatprep.subr.bf16.mxu1 %v3074_v3  ;;  %2901 = vmatprep.subr.bf16.mxu0 %v3074_v3 }
 0xb47   :  { %2673 = vmatprep.mubr.msk.f32.mxu1 %vm3075_vm1, %v3076_v4  ;;  %2684 = vmatprep.mubr.msk.f32.mxu0 %vm3075_vm1, %v3076_v4 }
 0xb49   :  { %2897 = vmatpush3.bf16.msra.mxu1 %v3230_v61  ;;  %2903 = vmatpush3.bf16.msra.mxu0 %v3162_v17 }
 0xb4a   :  { %2904 = vmatprep.subr.bf16.mxu1 %v3074_v3  ;;  %2910 = vmatprep.subr.bf16.mxu0 %v3074_v3 }
 0xc17   :  { %v952_v7 = vpop.f32.mrb[22].mxu0 }
 0xc18   :  { %v956_v8 = vadd.f32 %v952_v7, %v3200_v35  ;;  %v2664_v9 = vpop.f32.mrb[23].mxu0 }
 0xc1a   :  { %v957_v10 = vmul.f32 %v956_v8, %v3206_v42 }
 0xc1c   :  { %3026 = vtanh.f32 %v957_v10 }
 0xc26   :  { %v3027_v11 = vpop.eup %3026 }
 0xc27   :  { %v959_v13 = vmul.f32 %v3027_v11, %v3206_v42 }
 0xc29   :  { %v960_v14 = vadd.f32 %v959_v13, %v3209_v48 }
 0xc2b   :  { %963 = vrot.lane.b32.xlu0 %v960_v14, %s3078_s0  ;;  %v961_v18 = vmul.f32 %v960_v14, %v801_v0 }
 0xc9d   :  { %v964_v15 = vpop.permute.xlu0 %963 }
 0xc9e   :  { %v966_v16 = vmul.f32 %v964_v15, %v960_v14  ;;  %v2402_v15 = vld [vmem:[%s3560_s3 + $0x28] sm:$0xff] }
 0xca0   :  { %968 = vrot.lane.b32.xlu1 %v966_v16, %s3079_s30 }
 0xd12   :  { %v969_v19 = vpop.permute.xlu1 %968 }
 0xd13   :  { %v971_v20 = vadd.f32 %v969_v19, %v961_v18  ;;  %v2403_v18 = vld [vmem:[%s3560_s3 + $0x30] sm:$0xff]  ;;  %v2404_v19 = vld [vmem:[%s3560_s3 + $0x38] sm:$0xff] }
 0xd15   :  { %3028 = vtanh.f32 %v971_v20 }
 0xd1f   :  { %v3029_v35 = vpop.eup %3028 }
 0xd20   :  { %974 = vrot.lane.b32.xlu0 %v3029_v35, %s3078_s0  ;;  %v3417_v35 = vpack.c.bf16 %v2404_v19, %v2403_v18 }
 0xd92   :  { %v975_v21 = vpop.permute.xlu0 %974 }
 0xd93   :  { %v977_v22 = vmul.f32 %v975_v21, %v960_v14  ;;  %v2401_v14 = vld [vmem:[%s3560_s3 + $0x20] sm:$0xff] }
 0xd94   :  { %v3403_v16 = vpack.c.bf16 %v2402_v15, %v2401_v14  ;;  %v3434_v21 = vld [vmem:[%s3561_s4 + $0x1] ss:$0 sm:$0xff]  ;;  %s3080_s4 = smov 96  }
 0xd95   :  { %979 = vrot.lane.b32.xlu1 %v977_v22, %s3079_s30  ;;  %v370_v22 = vadd.f32 %v3434_v21, %v3255_v2 }
 0xe07   :  { %v980_v23 = vpop.permute.xlu1 %979 }
 0xe08   :  { %2674 = vmatmul.mubr.msk.f32.vlgmr.msra.gmra.mrb[2].mxu1 %vm48_vm0, %v980_v23  ;;  %2685 = vmatmul.mubr.msk.f32.vlgmr.msra.gmra.mrb[24].mxu0 %vm48_vm0, %v980_v23 }
 0xe09   :  { %2906 = vmatpush3.bf16.msra.mxu1 %v3224_v59  ;;  %2912 = vmatpush3.bf16.msra.mxu0 %v3144_v12 }
 0xe0a   :  { %2907 = vmatprep.subr.bf16.mxu1 %v3074_v3  ;;  %2913 = vmatprep.subr.bf16.mxu0 %v3074_v3 }
 0xe0b   :  { %2695 = vmatprep.mubr.msk.f32.mxu1 %vm3075_vm1, %v3076_v4  ;;  %2706 = vmatprep.mubr.msk.f32.mxu0 %vm3075_vm1, %v3076_v4 }
 0xe0d   :  { %2909 = vmatpush3.bf16.msra.mxu1 %v3230_v61  ;;  %2915 = vmatpush3.bf16.msra.mxu0 %v3162_v17 }
 0xe0e   :  { %2916 = vmatprep.subr.bf16.mxu1 %v3074_v3  ;;  %2922 = vmatprep.subr.bf16.mxu0 %v3074_v3 }
 0xedb   :  { %v1122_v25 = vpop.f32.mrb[24].mxu0 }
 0xedc   :  { %v1126_v26 = vadd.f32 %v1122_v25, %v3198_v33  ;;  %v2686_v27 = vpop.f32.mrb[25].mxu0 }
 0xede   :  { %v1127_v29 = vmul.f32 %v1126_v26, %v3206_v42 }
 0xee0   :  { %3030 = vtanh.f32 %v1127_v29 }
 0xeea   :  { %v3031_v31 = vpop.eup %3030 }
 0xeeb   :  { %v1129_v32 = vmul.f32 %v3031_v31, %v3206_v42 }
 0xeed   :  { %v1130_v34 = vadd.f32 %v1129_v32, %v3209_v48 }
 0xeef   :  { %1133 = vrot.lane.b32.xlu0 %v1130_v34, %s3078_s0  ;;  %v1131_v40 = vmul.f32 %v1130_v34, %v971_v20 }
 0xf61   :  { %v1134_v36 = vpop.permute.xlu0 %1133 }
 0xf62   :  { %v1136_v38 = vmul.f32 %v1134_v36, %v1130_v34 }
 0xf64   :  { %1138 = vrot.lane.b32.xlu1 %v1136_v38, %s3079_s30 }
 0xfd6   :  { %v1139_v41 = vpop.permute.xlu1 %1138 }
 0xfd7   :  { %v1141_v43 = vadd.f32 %v1139_v41, %v1131_v40 }
 0xfd9   :  { %3032 = vtanh.f32 %v1141_v43 }
 0xfe3   :  { %v3033_v33 = vpop.eup %3032 }
 0xfe4   :  { %1144 = vrot.lane.b32.xlu0 %v3033_v33, %s3078_s0 }
0x1056   :  { %v1145_v44 = vpop.permute.xlu0 %1144 }
0x1057   :  { %v1147_v30 = vmul.f32 %v1145_v44, %v1130_v34 }
0x1059   :  { %1149 = vrot.lane.b32.xlu1 %v1147_v30, %s3079_s30  ;;  %v540_v30 = vadd.f32 %v3434_v21, %v3279_v24 }
0x10cb   :  { %v1150_v45 = vpop.permute.xlu1 %1149 }
0x10cc   :  { %2696 = vmatmul.mubr.msk.f32.vlgmr.msra.gmra.mrb[4].mxu1 %vm48_vm0, %v1150_v45  ;;  %2707 = vmatmul.mubr.msk.f32.vlgmr.msra.gmra.mrb[26].mxu0 %vm48_vm0, %v1150_v45 }
0x10cd   :  { %2918 = vmatpush3.bf16.msra.mxu1 %v3224_v59  ;;  %2924 = vmatpush3.bf16.msra.mxu0 %v3144_v12 }
0x10ce   :  { %2919 = vmatprep.subr.bf16.mxu1 %v3074_v3  ;;  %2925 = vmatprep.subr.bf16.mxu0 %v3074_v3 }
0x10cf   :  { %2717 = vmatprep.mubr.msk.f32.mxu1 %vm3075_vm1, %v3076_v4  ;;  %2728 = vmatprep.mubr.msk.f32.mxu0 %vm3075_vm1, %v3076_v4 }
0x10d1   :  { %2921 = vmatpush3.bf16.msra.mxu1 %v3230_v61  ;;  %2927 = vmatpush3.bf16.msra.mxu0 %v3162_v17 }
0x10d2   :  { %2928 = vmatprep.subr.bf16.mxu1 %v3074_v3 }
0x119f   :  { %v1292_v46 = vpop.f32.mrb[26].mxu0 }
0x11a0   :  { %v1296_v47 = vadd.f32 %v1292_v46, %v3204_v39  ;;  %v2708_v12 = vpop.f32.mrb[27].mxu0 }
0x11a2   :  { %v1297_v50 = vmul.f32 %v1296_v47, %v3206_v42 }
0x11a4   :  { %3034 = vtanh.f32 %v1297_v50 }
0x11ae   :  { %v3035_v51 = vpop.eup %3034 }
0x11af   :  { %v1299_v52 = vmul.f32 %v3035_v51, %v3206_v42 }
0x11b1   :  { %v1300_v53 = vadd.f32 %v1299_v52, %v3209_v48 }
0x11b3   :  { %1303 = vrot.lane.b32.xlu0 %v1300_v53, %s3078_s0  ;;  %v1301_v17 = vmul.f32 %v1300_v53, %v1141_v43 }
0x1225   :  { %v1304_v54 = vpop.permute.xlu0 %1303 }
0x1226   :  { %v1306_v55 = vmul.f32 %v1304_v54, %v1300_v53 }
0x1228   :  { %1308 = vrot.lane.b32.xlu1 %v1306_v55, %s3079_s30 }
0x129a   :  { %v1309_v56 = vpop.permute.xlu1 %1308 }
0x129b   :  { %v1311_v57 = vadd.f32 %v1309_v56, %v1301_v17 }
0x129d   :  { %3036 = vtanh.f32 %v1311_v57 }
0x12a7   :  { %v3037_v39 = vpop.eup %3036 }
0x12a8   :  { %1314 = vrot.lane.b32.xlu0 %v3037_v39, %s3078_s0 }
0x131a   :  { %v1315_v58 = vpop.permute.xlu0 %1314 }
0x131b   :  { %v1317_v60 = vmul.f32 %v1315_v58, %v1300_v53 }
0x131d   :  { %1319 = vrot.lane.b32.xlu1 %v1317_v60, %s3079_s30  ;;  %v710_v60 = vadd.f32 %v3434_v21, %v3303_v49 }
0x138f   :  { %v1320_v62 = vpop.permute.xlu1 %1319 }
0x1390   :  { %2718 = vmatmul.mubr.msk.f32.vlgmr.msra.gmra.mrb[6].mxu1 %vm48_vm0, %v1320_v62  ;;  %2729 = vmatmul.mubr.msk.f32.vlgmr.msra.gmra.mrb[28].mxu0 %vm48_vm0, %v1320_v62 }
0x1391   :  { %2930 = vmatpush3.bf16.msra.mxu1 %v3224_v59  ;;  %2739 = vmatprep.mubr.msk.f32.mxu1 %vm3075_vm1, %v3076_v4 }
0x1392   :  { %2931 = vmatprep.subr.bf16.mxu1 %v3074_v3 }
0x1395   :  { %2933 = vmatpush3.bf16.msra.mxu1 %v3230_v61 }
0x1396   :  { %2934 = vmatprep.subr.bf16.mxu1 %v3074_v3 }
0x1463   :  { %v1462_v63 = vpop.f32.mrb[28].mxu0 }
0x1464   :  { %v1466_v0 = vadd.f32 %v1462_v63, %v3202_v37  ;;  %v2730_v28 = vpop.f32.mrb[29].mxu0 }
0x1466   :  { %v1467_v1 = vmul.f32 %v1466_v0, %v3206_v42 }
0x1468   :  { %3038 = vtanh.f32 %v1467_v1 }
0x1472   :  { %v3039_v5 = vpop.eup %3038 }
0x1473   :  { %v1469_v6 = vmul.f32 %v3039_v5, %v3206_v42 }
0x1475   :  { %v1470_v59 = vadd.f32 %v1469_v6, %v3209_v48 }
0x1477   :  { %1473 = vrot.lane.b32.xlu0 %v1470_v59, %s3078_s0  ;;  %v1471_v61 = vmul.f32 %v1470_v59, %v1311_v57 }
0x14e9   :  { %v1474_v7 = vpop.permute.xlu0 %1473 }
0x14ea   :  { %v1476_v8 = vmul.f32 %v1474_v7, %v1470_v59 }
0x14ec   :  { %1478 = vrot.lane.b32.xlu1 %v1476_v8, %s3079_s30 }
0x155e   :  { %v1479_v9 = vpop.permute.xlu1 %1478 }
0x155f   :  { %v3392_v10 = vadd.f32 %v1479_v9, %v1471_v61 }
0x1561   :  { %3040 = vtanh.f32 %v3392_v10 }
0x156b   :  { %v3041_v37 = vpop.eup %3040 }
0x156c   :  { %1484 = vrot.lane.b32.xlu0 %v3041_v37, %s3078_s0 }
0x15de   :  { %v1485_v11 = vpop.permute.xlu0 %1484 }
0x15df   :  { %v1487_v13 = vmul.f32 %v1485_v11, %v1470_v59 }
0x15e1   :  { %1489 = vrot.lane.b32.xlu1 %v1487_v13, %s3079_s30 }
0x1653   :  { %v1490_v20 = vpop.permute.xlu1 %1489 }
0x1654   :  { %1565 = vst.msk [vmem:[%s3563_s5] sm:$0xff] %vm48_vm0, %v1490_v20  ;;  %2740 = vmatmul.mubr.msk.f32.vlgmr.msra.gmra.mrb[8].mxu1 %vm48_vm0, %v1490_v20 }
0x1655   :  { %2936 = vmatpush3.bf16.msra.mxu1 %v3403_v16  ;;  %2750 = vmatprep.mubr.msk.f32.mxu1 %vm3075_vm1, %v3076_v4 }
0x1656   :  { %2937 = vmatprep.subr.bf16.mxu1 %v3074_v3 }
0x1659   :  { %2939 = vmatpush3.bf16.msra.mxu1 %v3417_v35 }
0x165a   :  { %2940 = vmatprep.subr.bf16.mxu1 %v3074_v3 }
0x165c   :  { %2751 = vmatmul.mubr.f32.vlgmr.msra.gmra.mrb[10].mxu1 %v3076_v4 }
0x165d   :  { %2942 = vmatpush3.bf16.msra.mxu1 %v3403_v16  ;;  %2761 = vmatprep.mubr.msk.f32.mxu1 %vm3075_vm1, %v3076_v4 }
0x165e   :  { %2943 = vmatprep.subr.bf16.mxu1 %v3074_v3 }
0x1661   :  { %2945 = vmatpush3.bf16.msra.mxu1 %v3417_v35 }
0x1662   :  { %2946 = vmatprep.subr.bf16.mxu1 %v3074_v3 }
0x172f   :  { %v1643_v23 = vpop.f32.mrb[10].mxu1 }
0x1730   :  { %v1647_v25 = vadd.f32 %v1643_v23, %v370_v22  ;;  %v2752_v26 = vpop.f32.mrb[11].mxu1 }
0x1732   :  { %v1648_v27 = vmul.f32 %v1647_v25, %v3206_v42 }
0x1734   :  { %3042 = vtanh.f32 %v1648_v27 }
0x173e   :  { %v3043_v29 = vpop.eup %3042 }
0x173f   :  { %v1650_v31 = vmul.f32 %v3043_v29, %v3206_v42 }
0x1741   :  { %v1651_v32 = vadd.f32 %v1650_v31, %v3209_v48 }
0x1743   :  { %1654 = vrot.lane.b32.xlu0 %v1651_v32, %s3078_s0  ;;  %v1652_v38 = vmul.f32 0.0, %v1651_v32 }
0x17b5   :  { %v1655_v34 = vpop.permute.xlu0 %1654 }
0x17b6   :  { %v1657_v36 = vmul.f32 %v1655_v34, %v1651_v32 }
0x17b8   :  { %1659 = vrot.lane.b32.xlu1 %v1657_v36, %s3079_s30 }
0x182a   :  { %v1660_v40 = vpop.permute.xlu1 %1659 }
0x182b   :  { %v1662_v2 = vadd.f32 %v1660_v40, %v1652_v38 }
0x182d   :  { %3044 = vtanh.f32 %v1662_v2 }
0x1837   :  { %v3045_v41 = vpop.eup %3044 }
0x1838   :  { %1665 = vrot.lane.b32.xlu0 %v3045_v41, %s3078_s0 }
0x18aa   :  { %v1666_v43 = vpop.permute.xlu0 %1665 }
0x18ab   :  { %v1668_v33 = vmul.f32 %v1666_v43, %v1651_v32 }
0x18ad   :  { %1671 = vrot.lane.b32.xlu1 %v1668_v33, %s3079_s30 }
0x191f   :  { %v1672_v44 = vpop.permute.xlu1 %1671 }
0x1920   :  { %2762 = vmatmul.mubr.msk.f32.vlgmr.msra.gmra.mrb[12].mxu1 %vm48_vm0, %v1672_v44 }
0x1921   :  { %2948 = vmatpush3.bf16.msra.mxu1 %v3403_v16  ;;  %2772 = vmatprep.mubr.msk.f32.mxu1 %vm3075_vm1, %v3076_v4 }
0x1922   :  { %2949 = vmatprep.subr.bf16.mxu1 %v3074_v3 }
0x1925   :  { %2951 = vmatpush3.bf16.msra.mxu1 %v3417_v35 }
0x1926   :  { %2952 = vmatprep.subr.bf16.mxu1 %v3074_v3 }
0x19f3   :  { %v1741_v45 = vpop.f32.mrb[12].mxu1 }
0x19f4   :  { %v1745_v46 = vadd.f32 %v1741_v45, %v540_v30  ;;  %v2763_v47 = vpop.f32.mrb[13].mxu1 }
0x19f6   :  { %v1746_v12 = vmul.f32 %v1745_v46, %v3206_v42 }
0x19f8   :  { %3046 = vtanh.f32 %v1746_v12 }
0x1a02   :  { %v3047_v50 = vpop.eup %3046 }
0x1a03   :  { %v1748_v51 = vmul.f32 %v3047_v50, %v3206_v42 }
0x1a05   :  { %v1749_v52 = vadd.f32 %v1748_v51, %v3209_v48 }
0x1a07   :  { %1752 = vrot.lane.b32.xlu0 %v1749_v52, %s3078_s0  ;;  %v1750_v55 = vmul.f32 %v1749_v52, %v1662_v2 }
0x1a79   :  { %v1753_v53 = vpop.permute.xlu0 %1752 }
0x1a7a   :  { %v1755_v54 = vmul.f32 %v1753_v53, %v1749_v52 }
0x1a7c   :  { %1757 = vrot.lane.b32.xlu1 %v1755_v54, %s3079_s30 }
0x1aee   :  { %v1758_v17 = vpop.permute.xlu1 %1757 }
0x1aef   :  { %v1760_v24 = vadd.f32 %v1758_v17, %v1750_v55 }
0x1af1   :  { %3048 = vtanh.f32 %v1760_v24 }
0x1afb   :  { %v3049_v56 = vpop.eup %3048 }
0x1afc   :  { %1763 = vrot.lane.b32.xlu0 %v3049_v56, %s3078_s0 }
0x1b6e   :  { %v1764_v57 = vpop.permute.xlu0 %1763 }
0x1b6f   :  { %v1766_v39 = vmul.f32 %v1764_v57, %v1749_v52 }
0x1b71   :  { %1769 = vrot.lane.b32.xlu1 %v1766_v39, %s3079_s30 }
0x1be3   :  { %v1770_v58 = vpop.permute.xlu1 %1769 }
0x1be4   :  { %2773 = vmatmul.mubr.msk.f32.vlgmr.msra.gmra.mrb[14].mxu1 %vm48_vm0, %v1770_v58 }
0x1be5   :  { %2954 = vmatpush3.bf16.msra.mxu1 %v3403_v16  ;;  %2783 = vmatprep.mubr.msk.f32.mxu1 %vm3075_vm1, %v3076_v4 }
0x1be6   :  { %2955 = vmatprep.subr.bf16.mxu1 %v3074_v3 }
0x1be9   :  { %2957 = vmatpush3.bf16.msra.mxu1 %v3417_v35 }
0x1bea   :  { %2958 = vmatprep.subr.bf16.mxu1 %v3074_v3 }
0x1cb7   :  { %v1839_v62 = vpop.f32.mrb[14].mxu1 }
0x1cb8   :  { %v1843_v63 = vadd.f32 %v1839_v62, %v710_v60  ;;  %v2774_v0 = vpop.f32.mrb[15].mxu1 }
0x1cba   :  { %v1844_v28 = vmul.f32 %v1843_v63, %v3206_v42 }
0x1cbc   :  { %3050 = vtanh.f32 %v1844_v28 }
0x1cc6   :  { %v3051_v1 = vpop.eup %3050 }
0x1cc7   :  { %v1846_v5 = vmul.f32 %v3051_v1, %v3206_v42 }
0x1cc9   :  { %v1847_v6 = vadd.f32 %v1846_v5, %v3209_v48 }
0x1ccb   :  { %1850 = vrot.lane.b32.xlu0 %v1847_v6, %s3078_s0  ;;  %v1848_v8 = vmul.f32 %v1847_v6, %v1760_v24 }
0x1d3d   :  { %v1851_v59 = vpop.permute.xlu0 %1850 }
0x1d3e   :  { %v1853_v7 = vmul.f32 %v1851_v59, %v1847_v6 }
0x1d40   :  { %1855 = vrot.lane.b32.xlu1 %v1853_v7, %s3079_s30 }
0x1db2   :  { %v1856_v61 = vpop.permute.xlu1 %1855 }
0x1db3   :  { %v1858_v49 = vadd.f32 %v1856_v61, %v1848_v8 }
0x1db5   :  { %3052 = vtanh.f32 %v1858_v49 }
0x1dbf   :  { %v3053_v9 = vpop.eup %3052 }
0x1dc0   :  { %1861 = vrot.lane.b32.xlu0 %v3053_v9, %s3078_s0 }
0x1e32   :  { %v1862_v37 = vpop.permute.xlu0 %1861 }
0x1e33   :  { %v1864_v11 = vmul.f32 %v1862_v37, %v1847_v6 }
0x1e35   :  { %1867 = vrot.lane.b32.xlu1 %v1864_v11, %s3079_s30 }
0x1ea7   :  { %v1868_v13 = vpop.permute.xlu1 %1867 }
0x1ea8   :  { %2784 = vmatmul.mubr.msk.f32.vlgmr.msra.gmra.mrb[0].mxu1 %vm48_vm0, %v1868_v13 }
0x1ea9   :  { %2960 = vmatpush3.bf16.msra.mxu1 %v3403_v16  ;;  %2794 = vmatprep.mubr.msk.f32.mxu1 %vm3075_vm1, %v3076_v4 }
0x1eaa   :  { %2961 = vmatprep.subr.bf16.mxu1 %v3074_v3 }
0x1ead   :  { %2963 = vmatpush3.bf16.msra.mxu1 %v3417_v35 }
0x1eae   :  { %2964 = vmatprep.subr.bf16.mxu1 %v3074_v3 }
0x1f7b   :  { %v1937_v14 = vpop.f32.mrb[0].mxu1 }
0x1f7c   :  { %v2988_v15 = vadd.f32 %v3434_v21, %v1937_v14  ;;  %v2785_v18 = vpop.f32.mrb[1].mxu1 }
0x1f7e   :  { %v1942_v19 = vmul.f32 %v2988_v15, %v3206_v42 }
0x1f80   :  { %3054 = vtanh.f32 %v1942_v19 }
0x1f8a   :  { %v3055_v20 = vpop.eup %3054 }
0x1f8b   :  { %v1944_v22 = vmul.f32 %v3055_v20, %v3206_v42 }
0x1f8d   :  { %v1945_v23 = vadd.f32 %v1944_v22, %v3209_v48 }
0x1f8f   :  { %1948 = vrot.lane.b32.xlu0 %v1945_v23, %s3078_s0  ;;  %v1946_v27 = vmul.f32 %v1945_v23, %v1858_v49 }
0x2001   :  { %v1949_v25 = vpop.permute.xlu0 %1948 }
0x2002   :  { %v1951_v26 = vmul.f32 %v1949_v25, %v1945_v23 }
0x2004   :  { %1953 = vrot.lane.b32.xlu1 %v1951_v26, %s3079_s30 }
0x2076   :  { %v1954_v29 = vpop.permute.xlu1 %1953 }
0x2077   :  { %v1956_v31 = vadd.f32 %v1954_v29, %v1946_v27 }
0x2079   :  { %3056 = vtanh.f32 %v1956_v31 }
0x2083   :  { %v3057_v32 = vpop.eup %3056 }
0x2084   :  { %1959 = vrot.lane.b32.xlu0 %v3057_v32, %s3078_s0 }
0x20f6   :  { %v1960_v34 = vpop.permute.xlu0 %1959 }
0x20f7   :  { %v1962_v36 = vmul.f32 %v1960_v34, %v1945_v23 }
0x20f9   :  { %1965 = vrot.lane.b32.xlu1 %v1962_v36, %s3079_s30 }
0x216b   :  { %v1966_v38 = vpop.permute.xlu1 %1965 }
0x216c   :  { %2795 = vmatmul.mubr.msk.f32.vlgmr.msra.gmra.mrb[2].mxu1 %vm48_vm0, %v1966_v38 }
0x216d   :  { %2966 = vmatpush3.bf16.msra.mxu1 %v3403_v16  ;;  %2805 = vmatprep.mubr.msk.f32.mxu1 %vm3075_vm1, %v3076_v4 }
0x216e   :  { %2967 = vmatprep.subr.bf16.mxu1 %v3074_v3 }
0x2171   :  { %2969 = vmatpush3.bf16.msra.mxu1 %v3417_v35 }
0x2172   :  { %2970 = vmatprep.subr.bf16.mxu1 %v3074_v3 }
0x223f   :  { %v2035_v40 = vpop.f32.mrb[2].mxu1 }
0x2240   :  { %v2989_v2 = vadd.f32 %v3434_v21, %v2035_v40  ;;  %v2796_v41 = vpop.f32.mrb[3].mxu1 }
0x2242   :  { %v2040_v43 = vmul.f32 %v2989_v2, %v3206_v42 }
0x2244   :  { %3058 = vtanh.f32 %v2040_v43 }
0x224e   :  { %v3059_v33 = vpop.eup %3058 }
0x224f   :  { %v2042_v44 = vmul.f32 %v3059_v33, %v3206_v42 }
0x2251   :  { %v2043_v30 = vadd.f32 %v2042_v44, %v3209_v48 }
0x2253   :  { %2046 = vrot.lane.b32.xlu0 %v2043_v30, %s3078_s0  ;;  %v2044_v47 = vmul.f32 %v2043_v30, %v1956_v31 }
0x22c5   :  { %v2047_v45 = vpop.permute.xlu0 %2046 }
0x22c6   :  { %v2049_v46 = vmul.f32 %v2047_v45, %v2043_v30 }
0x22c8   :  { %2051 = vrot.lane.b32.xlu1 %v2049_v46, %s3079_s30 }
0x233a   :  { %v2052_v12 = vpop.permute.xlu1 %2051 }
0x233b   :  { %v2054_v50 = vadd.f32 %v2052_v12, %v2044_v47 }
0x233d   :  { %3060 = vtanh.f32 %v2054_v50 }
0x2347   :  { %v3061_v51 = vpop.eup %3060 }
0x2348   :  { %2057 = vrot.lane.b32.xlu0 %v3061_v51, %s3078_s0 }
0x23ba   :  { %v2058_v52 = vpop.permute.xlu0 %2057 }
0x23bb   :  { %v2060_v53 = vmul.f32 %v2058_v52, %v2043_v30 }
0x23bd   :  { %2063 = vrot.lane.b32.xlu1 %v2060_v53, %s3079_s30 }
0x242f   :  { %v2064_v54 = vpop.permute.xlu1 %2063 }
0x2430   :  { %2806 = vmatmul.mubr.msk.f32.vlgmr.msra.gmra.mrb[4].mxu1 %vm48_vm0, %v2064_v54 }
0x2431   :  { %2972 = vmatpush3.bf16.msra.mxu1 %v3403_v16  ;;  %2816 = vmatprep.mubr.msk.f32.mxu1 %vm3075_vm1, %v3076_v4 }
0x2432   :  { %2973 = vmatprep.subr.bf16.mxu1 %v3074_v3 }
0x2435   :  { %2975 = vmatpush3.bf16.msra.mxu1 %v3417_v35 }
0x2436   :  { %2976 = vmatprep.subr.bf16.mxu1 %v3074_v3 }
0x2503   :  { %v2133_v55 = vpop.f32.mrb[4].mxu1 }
0x2504   :  { %v2990_v17 = vadd.f32 %v3434_v21, %v2133_v55  ;;  %v2807_v24 = vpop.f32.mrb[5].mxu1 }
0x2506   :  { %v2138_v56 = vmul.f32 %v2990_v17, %v3206_v42 }
0x2508   :  { %3062 = vtanh.f32 %v2138_v56 }
0x2512   :  { %v3063_v57 = vpop.eup %3062 }
0x2513   :  { %v2140_v39 = vmul.f32 %v3063_v57, %v3206_v42 }
0x2515   :  { %v2141_v58 = vadd.f32 %v2140_v39, %v3209_v48 }
0x2517   :  { %2144 = vrot.lane.b32.xlu0 %v2141_v58, %s3078_s0  ;;  %v2142_v63 = vmul.f32 %v2141_v58, %v2054_v50 }
0x2589   :  { %v2145_v60 = vpop.permute.xlu0 %2144 }
0x258a   :  { %v2147_v62 = vmul.f32 %v2145_v60, %v2141_v58 }
0x258c   :  { %2149 = vrot.lane.b32.xlu1 %v2147_v62, %s3079_s30 }
0x25fe   :  { %v2150_v0 = vpop.permute.xlu1 %2149 }
0x25ff   :  { %v2152_v28 = vadd.f32 %v2150_v0, %v2142_v63 }
0x2601   :  { %3064 = vtanh.f32 %v2152_v28 }
0x260b   :  { %v3065_v1 = vpop.eup %3064 }
0x260c   :  { %2155 = vrot.lane.b32.xlu0 %v3065_v1, %s3078_s0 }
0x267e   :  { %v2156_v5 = vpop.permute.xlu0 %2155 }
0x267f   :  { %v2158_v6 = vmul.f32 %v2156_v5, %v2141_v58 }
0x2681   :  { %2161 = vrot.lane.b32.xlu1 %v2158_v6, %s3079_s30 }
0x26f3   :  { %v2162_v59 = vpop.permute.xlu1 %2161 }
0x26f4   :  { %2817 = vmatmul.mubr.msk.f32.vlgmr.msra.gmra.mrb[6].mxu1 %vm48_vm0, %v2162_v59 }
0x26f5   :  { %2978 = vmatpush3.bf16.msra.mxu1 %v3403_v16  ;;  %2827 = vmatprep.mubr.msk.f32.mxu1 %vm3075_vm1, %v3076_v4 }
0x26f6   :  { %2979 = vmatprep.subr.bf16.mxu1 %v3074_v3 }
0x26f9   :  { %2981 = vmatpush3.bf16.msra.mxu1 %v3417_v35 }
0x27c7   :  { %v2231_v7 = vpop.f32.mrb[6].mxu1 }
0x27c8   :  { %v2991_v8 = vadd.f32 %v3434_v21, %v2231_v7  ;;  %v2818_v61 = vpop.f32.mrb[7].mxu1 }
0x27ca   :  { %v2236_v49 = vmul.f32 %v2991_v8, %v3206_v42 }
0x27cc   :  { %3066 = vtanh.f32 %v2236_v49 }
0x27d6   :  { %v3067_v9 = vpop.eup %3066 }
0x27d7   :  { %v2238_v37 = vmul.f32 %v3067_v9, %v3206_v42 }
0x27d9   :  { %v2239_v11 = vadd.f32 %v2238_v37, %v3209_v48 }
0x27db   :  { %2242 = vrot.lane.b32.xlu0 %v2239_v11, %s3078_s0  ;;  %v2240_v3 = vmul.f32 %v2239_v11, %v2152_v28 }
0x284d   :  { %v2243_v16 = vpop.permute.xlu0 %2242 }
0x284e   :  { %v2245_v4 = vmul.f32 %v2243_v16, %v2239_v11 }
0x2850   :  { %2247 = vrot.lane.b32.xlu1 %v2245_v4, %s3079_s30 }
0x28c2   :  { %v2248_v35 = vpop.permute.xlu1 %2247 }
0x28c3   :  { %v2250_v13 = vadd.f32 %v2248_v35, %v2240_v3 }
0x28c5   :  { %3068 = vtanh.f32 %v2250_v13 }
0x28cf   :  { %v3069_v14 = vpop.eup %3068 }
0x28d0   :  { %2253 = vrot.lane.b32.xlu0 %v3069_v14, %s3078_s0 }
0x2942   :  { %v2254_v15 = vpop.permute.xlu0 %2253 }
0x2943   :  { %v2256_v18 = vmul.f32 %v2254_v15, %v2239_v11 }
0x2945   :  { %2259 = vrot.lane.b32.xlu1 %v2256_v18, %s3079_s30 }
0x29b7   :  { %v2260_v19 = vpop.permute.xlu1 %2259 }
0x29b8   :  { %2828 = vmatmul.mubr.msk.f32.vlgmr.msra.gmra.mrb[8].mxu1 %vm48_vm0, %v2260_v19 }
0x2a8b   :  { %v2329_v20 = vpop.f32.mrb[8].mxu1 }
0x2a8c   :  { %v2992_v22 = vadd.f32 %v3434_v21, %v2329_v20  ;;  %v2829_v23 = vpop.f32.mrb[9].mxu1 }
0x2a8e   :  { %v2334_v25 = vmul.f32 %v2992_v22, %v3206_v42 }
0x2a90   :  { %3070 = vtanh.f32 %v2334_v25 }
0x2a9a   :  { %v3071_v26 = vpop.eup %3070 }
0x2a9b   :  { %v2336_v27 = vmul.f32 %v3071_v26, %v3206_v42 }
0x2a9d   :  { %v2337_v29 = vadd.f32 %v2336_v27, %v3209_v48 }
0x2a9f   :  { %2340 = vrot.lane.b32.xlu0 %v2337_v29, %s3078_s0  ;;  %v2338_v34 = vmul.f32 %v2337_v29, %v2250_v13 }
0x2b11   :  { %v2341_v31 = vpop.permute.xlu0 %2340 }
0x2b12   :  { %v2343_v32 = vmul.f32 %v2341_v31, %v2337_v29 }
0x2b14   :  { %2345 = vrot.lane.b32.xlu1 %v2343_v32, %s3079_s30 }
0x2b18   :  { %1567 = vrot.lane.b32.xlu1 %v3392_v10, %s3080_s4 }
0x2b86   :  { %v2346_v21 = vpop.permute.xlu1 %2345 }
0x2b87   :  { %v2348_v36 = vadd.f32 %v2346_v21, %v2338_v34 }
0x2b89   :  { %3072 = vtanh.f32 %v2348_v36  ;;  %2362 = vrot.lane.b32.xlu1 %v2348_v36, %s3080_s4 }
0x2b8a   :  { %v1568_v38 = vpop.permute.xlu1 %1567 }
0x2b8b   :  { %1570 = vst.msk [vmem:[%s3564_s6] sm:$0xff] %vm48_vm0, %v1568_v38 }
0x2b93   :  { %v3073_v42 = vpop.eup %3072 }
0x2b94   :  { %2351 = vrot.lane.b32.xlu0 %v3073_v42, %s3078_s0 }
0x2bfb   :  { %v2363_v48 = vpop.permute.xlu1 %2362 }
0x2bfc   :  { %2413 = vst.msk [vmem:[%s3564_s6 + $0x8] sm:$0xff] %vm48_vm0, %v2363_v48 }
0x2c06   :  { %v2352_v10 = vpop.permute.xlu0 %2351 }
0x2c07   :  { %v2354_v40 = vmul.f32 %v2352_v10, %v2337_v29 }
0x2c09   :  { %2356 = vrot.lane.b32.xlu0 %v2354_v40, %s3079_s30 }
0x2c7b   :  { %v2357_v2 = vpop.permute.xlu0 %2356 }
0x2c7c   :  { %2412 = vst.msk [vmem:[%s3563_s5 + $0x8] sm:$0xff] %vm48_vm0, %v2357_v2 }

</bundles_post_ra>
